<compile_context>
chip_gen: v7x
topology: tpu7x:2x2x1
jax: 0.10.0
libtpu: 0.0.40
codegen_flags: <defaults>
</compile_context>

<pallas_src>
import functools

import numpy as np
import jax
import jax.numpy as jnp
from jax.experimental import pallas as pl
from jax.experimental.pallas import tpu as pltpu


# ----------------------------------------------------------------------------
# In-kernel helpers
# ----------------------------------------------------------------------------
def _floor(x):
    """floor() built from cast/compare/where only (guaranteed to lower)."""
    t = x.astype(jnp.int32).astype(jnp.float32)      # truncate toward zero
    return t - jnp.where(x < t, 1.0, 0.0)


def _sin_vec(x):
    """Vector sine using only VPU-safe ops (mul/add/cast/compare).

    Range-reduce x = k*pi + r, r in [-pi/2, pi/2]; sin(x) = (-1)^k * sin(r);
    sin(r) via an 11th-order odd Taylor polynomial (max err ~6e-8).
    """
    inv_pi = 0.31830988618379067
    pi = 3.141592653589793
    k = _floor(x * inv_pi + 0.5)
    r = x - k * pi
    half = k * 0.5
    parity = half - _floor(half)                     # 0.0 (even k) / 0.5 (odd k)
    sign = 1.0 - 4.0 * parity                        # +1 / -1
    r2 = r * r
    p = r * (1.0 + r2 * (-1.0 / 6.0
             + r2 * (1.0 / 120.0
             + r2 * (-1.0 / 5040.0
             + r2 * (1.0 / 362880.0
             + r2 * (-1.0 / 39916800.0))))))
    return sign * p


# ----------------------------------------------------------------------------
# The fused forward kernel
# ----------------------------------------------------------------------------
def _net_kernel(x_ref, w1_ref, b1_ref, s1e_ref, s1o_ref, r1e_ref, r1o_ref,
                w2_ref, b2_ref, s2e_ref, s2o_ref, r2e_ref, r2o_ref,
                wf1_ref, bf1_ref, wf2_ref, bf2_ref, wf3_ref, bf3_ref,
                o_ref, p1_scr, p2_scr):
    f32 = jnp.float32
    dot = functools.partial(jnp.dot, preferred_element_type=f32)

    # ---- conv1 (1->6, k=5) + bias + ReLU : (24, 144), lane = w*6 + c_out ----
    y1 = dot(x_ref[0:24, :], w1_ref[0])
    for i in range(1, 5):
        y1 = y1 + dot(x_ref[i:i + 24, :], w1_ref[i])
    y1 = jnp.maximum(y1 + b1_ref[...], 0.0)

    # ---- maxpool 2x2 via 0/1 selection matmuls -> (12, 72), lane = w*6+c ----
    cp1 = jnp.maximum(dot(y1, s1e_ref[...]), dot(y1, s1o_ref[...]))      # (24, 72)
    p1_scr[...] = jnp.maximum(dot(r1e_ref[...], cp1), dot(r1o_ref[...], cp1))

    # ---- conv2 (6->16, k=5) + bias + ReLU : (8, 128), lane = w*16 + c_out ----
    y2 = dot(p1_scr[0:8, :], w2_ref[0])
    for i in range(1, 5):
        y2 = y2 + dot(p1_scr[i:i + 8, :], w2_ref[i])
    y2 = jnp.maximum(y2 + b2_ref[...], 0.0)

    # Dropout2d: identity (eval-mode semantics).
    # ---- maxpool 2x2 -> (4, 64), lane = w*16 + c ----
    cp2 = jnp.maximum(dot(y2, s2e_ref[...]), dot(y2, s2o_ref[...]))      # (8, 64)
    p2_scr[...] = jnp.maximum(dot(r2e_ref[...], cp2), dot(r2o_ref[...], cp2))

    # ---- fc1 (256->64) with the NCHW flatten folded into the weights ----
    h1 = dot(p2_scr[0:1, :], wf1_ref[0])
    for h in range(1, 4):
        h1 = h1 + dot(p2_scr[h:h + 1, :], wf1_ref[h])
    h1 = jnp.maximum(h1 + bf1_ref[...], 0.0)                             # (1, 64)

    # ---- fc2 (64->2): the two circuit parameters ----
    theta = dot(h1, wf2_ref[...]) + bf2_ref[...]                         # (1, 2)

    # ---- hybrid quantum layer (analytic measurement probabilities) ----
    # Circuit: H x H ; CX RZ(t0) CX ; RX(t1) x RX(t1); measure.
    # Probabilities in QC_OUTPUTS order ['11','10','01','00'] are
    #   0.25 + 0.25*sin(t0)*sin(2*t1) * [+1, -1, -1, +1].
    # TODO(synk): finite-shot sampling on an IBMQ backend has no Pallas
    # equivalent; the exact (infinite-shot) expectation is computed instead.
    lane2 = jax.lax.broadcasted_iota(jnp.int32, (1, 2), 1)
    ang = theta * jnp.where(lane2 == 0, f32(1.0), f32(2.0))              # (t0, 2*t1)
    sv = _sin_vec(ang)                                                   # (sin t0, sin 2t1)
    s0 = jnp.sum(sv * (lane2 == 0).astype(f32), axis=1, keepdims=True)   # (1, 1)
    s1 = jnp.sum(sv * (lane2 == 1).astype(f32), axis=1, keepdims=True)   # (1, 1)
    s = s0 * s1
    lane4 = jax.lax.broadcasted_iota(jnp.int32, (1, 4), 1)
    sgn = jnp.where((lane4 == 0) | (lane4 == 3), f32(1.0), f32(-1.0))
    q = 0.25 + 0.25 * s * sgn                                            # (1, 4)

    # ---- fc3 (4->2) ----
    o_ref[...] = (dot(q, wf3_ref[...]) + bf3_ref[...]).astype(o_ref.dtype)


# ----------------------------------------------------------------------------
# Host-side one-time weight layout preparation (torch layout -> kernel layout)
# ----------------------------------------------------------------------------
def _pool_selectors(w_in, c, h_in):
    """0/1 matrices implementing 2x2 pooling selection on (h, w*c) layouts."""
    w_out, h_out = w_in // 2, h_in // 2
    se = np.zeros((w_in * c, w_out * c), np.float32)
    so = np.zeros((w_in * c, w_out * c), np.float32)
    for wo in range(w_out):
        for ch in range(c):
            se[(2 * wo) * c + ch, wo * c + ch] = 1.0
            so[(2 * wo + 1) * c + ch, wo * c + ch] = 1.0
    re = np.zeros((h_out, h_in), np.float32)
    ro = np.zeros((h_out, h_in), np.float32)
    for ho in range(h_out):
        re[ho, 2 * ho] = 1.0
        ro[ho, 2 * ho + 1] = 1.0
    return se, so, re, ro


def prepare_operands(params):
    w1 = np.asarray(params["conv1_w"], np.float32)    # (6, 1, 5, 5)
    b1 = np.asarray(params["conv1_b"], np.float32)
    w2 = np.asarray(params["conv2_w"], np.float32)    # (16, 6, 5, 5)
    b2 = np.asarray(params["conv2_b"], np.float32)
    f1 = np.asarray(params["fc1_w"], np.float32)      # (64, 256), in idx = c*16+h*4+w
    bf1 = np.asarray(params["fc1_b"], np.float32)
    f2 = np.asarray(params["fc2_w"], np.float32)      # (2, 64)
    bf2 = np.asarray(params["fc2_b"], np.float32)
    f3 = np.asarray(params["fc3_w"], np.float32)      # (2, 4)
    bf3 = np.asarray(params["fc3_b"], np.float32)

    # conv1 expanded weights: y1[h, w*6+co] = sum_i (x[i:i+24, :] @ w1big[i])
    w1big = np.zeros((5, 28, 24 * 6), np.float32)
    for i in range(5):
        for j in range(5):
            for w_ in range(24):
                w1big[i, w_ + j, w_ * 6:(w_ + 1) * 6] = w1[:, 0, i, j]
    b1row = np.tile(b1, 24)[None, :]                  # (1, 144)

    # conv2 expanded weights: input lanes = w*6+ci (w<12), output = w*16+co (w<8)
    w2big = np.zeros((5, 12 * 6, 8 * 16), np.float32)
    for i in range(5):
        for j in range(5):
            for w_ in range(8):
                col = w_ + j
                for ci in range(6):
                    w2big[i, col * 6 + ci, w_ * 16:(w_ + 1) * 16] = w2[:, ci, i, j]
    b2row = np.tile(b2, 8)[None, :]                   # (1, 128)

    s1e, s1o, r1e, r1o = _pool_selectors(24, 6, 24)
    s2e, s2o, r2e, r2o = _pool_selectors(8, 16, 8)

    # fc1 with the torch NCHW flatten (idx = c*16 + h*4 + w) folded in; the
    # kernel's flattened activation layout is p2[h, w*16 + c].
    wf1 = np.zeros((4, 64, 64), np.float32)
    for h in range(4):
        for w_ in range(4):
            for c in range(16):
                wf1[h, w_ * 16 + c, :] = f1[:, c * 16 + h * 4 + w_]
    bf1row = bf1[None, :]

    wf2 = np.ascontiguousarray(f2.T)                  # (64, 2)
    bf2row = bf2[None, :]
    wf3 = np.ascontiguousarray(f3.T)                  # (4, 2)
    bf3row = bf3[None, :]

    ops = (w1big, b1row, s1e, s1o, r1e, r1o,
           w2big, b2row, s2e, s2o, r2e, r2o,
           wf1, bf1row, wf2, bf2row, wf3, bf3row)
    return tuple(jnp.asarray(o) for o in ops)


# ----------------------------------------------------------------------------
# Forward wrapper (single fused pallas_call, everything in VMEM)
# ----------------------------------------------------------------------------
@jax.jit
def net_forward(x_nchw, operands):
    x2d = jnp.asarray(x_nchw, jnp.float32).reshape(28, 28)
    args = (x2d,) + tuple(operands)
    vmem = pl.BlockSpec(memory_space=pltpu.MemorySpace.VMEM)
    return pl.pallas_call(
        _net_kernel,
        out_shape=jax.ShapeDtypeStruct((1, 2), jnp.float32),
        in_specs=[vmem] * len(args),
        out_specs=vmem,
        scratch_shapes=[pltpu.VMEM((12, 72), jnp.float32),
                        pltpu.VMEM((4, 64), jnp.float32)],
    )(*args)


# ----------------------------------------------------------------------------
# Parameters (torch-layout) and a pure-JAX reference for validation
# ----------------------------------------------------------------------------
def init_params(key):
    ks = jax.random.split(key, 10)
    s = 0.1
    return {
        "conv1_w": jax.random.normal(ks[0], (6, 1, 5, 5), jnp.float32) * s,
        "conv1_b": jax.random.normal(ks[1], (6,), jnp.float32) * s,
        "conv2_w": jax.random.normal(ks[2], (16, 6, 5, 5), jnp.float32) * s,
        "conv2_b": jax.random.normal(ks[3], (16,), jnp.float32) * s,
        "fc1_w": jax.random.normal(ks[4], (64, 256), jnp.float32) * s,
        "fc1_b": jax.random.normal(ks[5], (64,), jnp.float32) * s,
        "fc2_w": jax.random.normal(ks[6], (2, 64), jnp.float32) * s,
        "fc2_b": jax.random.normal(ks[7], (2,), jnp.float32) * s,
        "fc3_w": jax.random.normal(ks[8], (2, 4), jnp.float32) * s,
        "fc3_b": jax.random.normal(ks[9], (2,), jnp.float32) * s,
    }


def reference_forward(x_nchw, params):
    x = jnp.asarray(x_nchw, jnp.float32)
    y = jax.lax.conv_general_dilated(
        x, params["conv1_w"], (1, 1), "VALID",
        dimension_numbers=("NCHW", "OIHW", "NCHW"))
    y = jnp.maximum(y + params["conv1_b"].reshape(1, 6, 1, 1), 0.0)
    y = jax.lax.reduce_window(y, -jnp.inf, jax.lax.max,
                              (1, 1, 2, 2), (1, 1, 2, 2), "VALID")
    y = jax.lax.conv_general_dilated(
        y, params["conv2_w"], (1, 1), "VALID",
        dimension_numbers=("NCHW", "OIHW", "NCHW"))
    y = jnp.maximum(y + params["conv2_b"].reshape(1, 16, 1, 1), 0.0)
    y = jax.lax.reduce_window(y, -jnp.inf, jax.lax.max,
                              (1, 1, 2, 2), (1, 1, 2, 2), "VALID")
    y = y.reshape(1, 256)
    y = jnp.maximum(y @ params["fc1_w"].T + params["fc1_b"], 0.0)
    th = y @ params["fc2_w"].T + params["fc2_b"]
    s = jnp.sin(th[0, 0]) * jnp.sin(2.0 * th[0, 1])
    q = (0.25 + 0.25 * s * jnp.array([1.0, -1.0, -1.0, 1.0], jnp.float32)).reshape(1, 4)
    return q @ params["fc3_w"].T + params["fc3_b"]


if __name__ == "__main__":
    key = jax.random.PRNGKey(0)
    k_in, k_par = jax.random.split(key)
    x = jax.random.normal(k_in, (1, 1, 28, 28), dtype=jnp.float32)
    params = init_params(k_par)
    operands = prepare_operands(params)

    out = net_forward(x, operands)
    jax.block_until_ready(out)
    assert out.shape == (1, 2) and out.dtype == jnp.float32

    ref = reference_forward(x, params)
    max_err = float(jnp.max(jnp.abs(out - ref)))
    assert max_err < 1e-2, f"kernel/reference mismatch: {max_err}"
    print("KERNEL_OK")
</pallas_src>

<mosaic_0001>
module attributes {stable_mosaic.version = 11 : i64} {
  func.func @_net_kernel(%arg0: memref<28x28xf32, #tpu.memory_space<vmem>>, %arg1: memref<5x28x144xf32, #tpu.memory_space<vmem>>, %arg2: memref<1x144xf32, #tpu.memory_space<vmem>>, %arg3: memref<144x72xf32, #tpu.memory_space<vmem>>, %arg4: memref<144x72xf32, #tpu.memory_space<vmem>>, %arg5: memref<12x24xf32, #tpu.memory_space<vmem>>, %arg6: memref<12x24xf32, #tpu.memory_space<vmem>>, %arg7: memref<5x72x128xf32, #tpu.memory_space<vmem>>, %arg8: memref<1x128xf32, #tpu.memory_space<vmem>>, %arg9: memref<128x64xf32, #tpu.memory_space<vmem>>, %arg10: memref<128x64xf32, #tpu.memory_space<vmem>>, %arg11: memref<4x8xf32, #tpu.memory_space<vmem>>, %arg12: memref<4x8xf32, #tpu.memory_space<vmem>>, %arg13: memref<4x64x64xf32, #tpu.memory_space<vmem>>, %arg14: memref<1x64xf32, #tpu.memory_space<vmem>>, %arg15: memref<64x2xf32, #tpu.memory_space<vmem>>, %arg16: memref<1x2xf32, #tpu.memory_space<vmem>>, %arg17: memref<4x2xf32, #tpu.memory_space<vmem>>, %arg18: memref<1x2xf32, #tpu.memory_space<vmem>>, %arg19: memref<1x2xf32, #tpu.memory_space<vmem>>, %arg20: memref<12x72xf32, #tpu.memory_space<vmem>>, %arg21: memref<4x64xf32, #tpu.memory_space<vmem>>) attributes {dimension_semantics = [], scalar_prefetch = 0 : i64, scratch_operands = 2 : i64, tpu.core_type = #tpu.core_type<tc>} {
    %c0 = arith.constant 0 : index
    %c0_0 = arith.constant 0 : index
    %0 = vector.load %arg0[%c0, %c0_0] : memref<28x28xf32, #tpu.memory_space<vmem>>, vector<24x28xf32>
    %c0_1 = arith.constant 0 : index
    %c0_2 = arith.constant 0 : index
    %c0_3 = arith.constant 0 : index
    %1 = vector.load %arg1[%c0_1, %c0_2, %c0_3] : memref<5x28x144xf32, #tpu.memory_space<vmem>>, vector<1x28x144xf32>
    %2 = vector.shape_cast %1 : vector<1x28x144xf32> to vector<28x144xf32>
    %cst = arith.constant dense<0.000000e+00> : vector<24x144xf32>
    %3 = tpu.matmul %0, %2, %cst {dimension_numbers = #tpu.dot_dimension_numbers<[1], [0], [0], [1], [0, 0, 1, 1], [], []>} : vector<24x28xf32>, vector<28x144xf32>, vector<24x144xf32> -> vector<24x144xf32>
    %c1 = arith.constant 1 : index
    %c0_4 = arith.constant 0 : index
    %4 = vector.load %arg0[%c1, %c0_4] : memref<28x28xf32, #tpu.memory_space<vmem>>, vector<24x28xf32>
    %c1_5 = arith.constant 1 : index
    %c0_6 = arith.constant 0 : index
    %c0_7 = arith.constant 0 : index
    %5 = vector.load %arg1[%c1_5, %c0_6, %c0_7] : memref<5x28x144xf32, #tpu.memory_space<vmem>>, vector<1x28x144xf32>
    %6 = vector.shape_cast %5 : vector<1x28x144xf32> to vector<28x144xf32>
    %cst_8 = arith.constant dense<0.000000e+00> : vector<24x144xf32>
    %7 = tpu.matmul %4, %6, %cst_8 {dimension_numbers = #tpu.dot_dimension_numbers<[1], [0], [0], [1], [0, 0, 1, 1], [], []>} : vector<24x28xf32>, vector<28x144xf32>, vector<24x144xf32> -> vector<24x144xf32>
    %8 = arith.addf %3, %7 : vector<24x144xf32>
    %c2 = arith.constant 2 : index
    %c0_9 = arith.constant 0 : index
    %9 = vector.load %arg0[%c2, %c0_9] : memref<28x28xf32, #tpu.memory_space<vmem>>, vector<24x28xf32>
    %c2_10 = arith.constant 2 : index
    %c0_11 = arith.constant 0 : index
    %c0_12 = arith.constant 0 : index
    %10 = vector.load %arg1[%c2_10, %c0_11, %c0_12] : memref<5x28x144xf32, #tpu.memory_space<vmem>>, vector<1x28x144xf32>
    %11 = vector.shape_cast %10 : vector<1x28x144xf32> to vector<28x144xf32>
    %cst_13 = arith.constant dense<0.000000e+00> : vector<24x144xf32>
    %12 = tpu.matmul %9, %11, %cst_13 {dimension_numbers = #tpu.dot_dimension_numbers<[1], [0], [0], [1], [0, 0, 1, 1], [], []>} : vector<24x28xf32>, vector<28x144xf32>, vector<24x144xf32> -> vector<24x144xf32>
    %13 = arith.addf %8, %12 : vector<24x144xf32>
    %c3 = arith.constant 3 : index
    %c0_14 = arith.constant 0 : index
    %14 = vector.load %arg0[%c3, %c0_14] : memref<28x28xf32, #tpu.memory_space<vmem>>, vector<24x28xf32>
    %c3_15 = arith.constant 3 : index
    %c0_16 = arith.constant 0 : index
    %c0_17 = arith.constant 0 : index
    %15 = vector.load %arg1[%c3_15, %c0_16, %c0_17] : memref<5x28x144xf32, #tpu.memory_space<vmem>>, vector<1x28x144xf32>
    %16 = vector.shape_cast %15 : vector<1x28x144xf32> to vector<28x144xf32>
    %cst_18 = arith.constant dense<0.000000e+00> : vector<24x144xf32>
    %17 = tpu.matmul %14, %16, %cst_18 {dimension_numbers = #tpu.dot_dimension_numbers<[1], [0], [0], [1], [0, 0, 1, 1], [], []>} : vector<24x28xf32>, vector<28x144xf32>, vector<24x144xf32> -> vector<24x144xf32>
    %18 = arith.addf %13, %17 : vector<24x144xf32>
    %c4 = arith.constant 4 : index
    %c0_19 = arith.constant 0 : index
    %19 = vector.load %arg0[%c4, %c0_19] : memref<28x28xf32, #tpu.memory_space<vmem>>, vector<24x28xf32>
    %c4_20 = arith.constant 4 : index
    %c0_21 = arith.constant 0 : index
    %c0_22 = arith.constant 0 : index
    %20 = vector.load %arg1[%c4_20, %c0_21, %c0_22] : memref<5x28x144xf32, #tpu.memory_space<vmem>>, vector<1x28x144xf32>
    %21 = vector.shape_cast %20 : vector<1x28x144xf32> to vector<28x144xf32>
    %cst_23 = arith.constant dense<0.000000e+00> : vector<24x144xf32>
    %22 = tpu.matmul %19, %21, %cst_23 {dimension_numbers = #tpu.dot_dimension_numbers<[1], [0], [0], [1], [0, 0, 1, 1], [], []>} : vector<24x28xf32>, vector<28x144xf32>, vector<24x144xf32> -> vector<24x144xf32>
    %23 = arith.addf %18, %22 : vector<24x144xf32>
    %c0_24 = arith.constant 0 : index
    %c0_25 = arith.constant 0 : index
    %24 = vector.load %arg2[%c0_24, %c0_25] : memref<1x144xf32, #tpu.memory_space<vmem>>, vector<1x144xf32>
    %25 = vector.broadcast %24 : vector<1x144xf32> to vector<24x144xf32>
    %26 = arith.addf %23, %25 : vector<24x144xf32>
    %cst_26 = arith.constant 0.000000e+00 : f32
    %27 = vector.broadcast %cst_26 : f32 to vector<24x144xf32>
    %28 = arith.maximumf %26, %27 : vector<24x144xf32>
    %c0_27 = arith.constant 0 : index
    %c0_28 = arith.constant 0 : index
    %29 = vector.load %arg3[%c0_27, %c0_28] : memref<144x72xf32, #tpu.memory_space<vmem>>, vector<144x72xf32>
    %cst_29 = arith.constant dense<0.000000e+00> : vector<24x72xf32>
    %30 = tpu.matmul %28, %29, %cst_29 {dimension_numbers = #tpu.dot_dimension_numbers<[1], [0], [0], [1], [0, 0, 1, 1], [], []>} : vector<24x144xf32>, vector<144x72xf32>, vector<24x72xf32> -> vector<24x72xf32>
    %c0_30 = arith.constant 0 : index
    %c0_31 = arith.constant 0 : index
    %31 = vector.load %arg4[%c0_30, %c0_31] : memref<144x72xf32, #tpu.memory_space<vmem>>, vector<144x72xf32>
    %cst_32 = arith.constant dense<0.000000e+00> : vector<24x72xf32>
    %32 = tpu.matmul %28, %31, %cst_32 {dimension_numbers = #tpu.dot_dimension_numbers<[1], [0], [0], [1], [0, 0, 1, 1], [], []>} : vector<24x144xf32>, vector<144x72xf32>, vector<24x72xf32> -> vector<24x72xf32>
    %33 = arith.maximumf %30, %32 : vector<24x72xf32>
    %c0_33 = arith.constant 0 : index
    %c0_34 = arith.constant 0 : index
    %34 = vector.load %arg5[%c0_33, %c0_34] : memref<12x24xf32, #tpu.memory_space<vmem>>, vector<12x24xf32>
    %cst_35 = arith.constant dense<0.000000e+00> : vector<12x72xf32>
    %35 = tpu.matmul %34, %33, %cst_35 {dimension_numbers = #tpu.dot_dimension_numbers<[1], [0], [0], [1], [0, 0, 1, 1], [], []>} : vector<12x24xf32>, vector<24x72xf32>, vector<12x72xf32> -> vector<12x72xf32>
    %c0_36 = arith.constant 0 : index
    %c0_37 = arith.constant 0 : index
    %36 = vector.load %arg6[%c0_36, %c0_37] : memref<12x24xf32, #tpu.memory_space<vmem>>, vector<12x24xf32>
    %cst_38 = arith.constant dense<0.000000e+00> : vector<12x72xf32>
    %37 = tpu.matmul %36, %33, %cst_38 {dimension_numbers = #tpu.dot_dimension_numbers<[1], [0], [0], [1], [0, 0, 1, 1], [], []>} : vector<12x24xf32>, vector<24x72xf32>, vector<12x72xf32> -> vector<12x72xf32>
    %38 = arith.maximumf %35, %37 : vector<12x72xf32>
    %c0_39 = arith.constant 0 : index
    %c0_40 = arith.constant 0 : index
    %39 = vector.load %arg20[%c0_39, %c0_40] : memref<12x72xf32, #tpu.memory_space<vmem>>, vector<12x72xf32>
    tpu.vector_store %arg20[%c0_39, %c0_40], %38 {strides = array<i32>} : memref<12x72xf32, #tpu.memory_space<vmem>>, vector<12x72xf32>,
    %c0_41 = arith.constant 0 : index
    %c0_42 = arith.constant 0 : index
    %40 = vector.load %arg20[%c0_41, %c0_42] : memref<12x72xf32, #tpu.memory_space<vmem>>, vector<8x72xf32>
    %c0_43 = arith.constant 0 : index
    %c0_44 = arith.constant 0 : index
    %c0_45 = arith.constant 0 : index
    %41 = vector.load %arg7[%c0_43, %c0_44, %c0_45] : memref<5x72x128xf32, #tpu.memory_space<vmem>>, vector<1x72x128xf32>
    %42 = vector.shape_cast %41 : vector<1x72x128xf32> to vector<72x128xf32>
    %cst_46 = arith.constant dense<0.000000e+00> : vector<8x128xf32>
    %43 = tpu.matmul %40, %42, %cst_46 {dimension_numbers = #tpu.dot_dimension_numbers<[1], [0], [0], [1], [0, 0, 1, 1], [], []>} : vector<8x72xf32>, vector<72x128xf32>, vector<8x128xf32> -> vector<8x128xf32>
    %c1_47 = arith.constant 1 : index
    %c0_48 = arith.constant 0 : index
    %44 = vector.load %arg20[%c1_47, %c0_48] : memref<12x72xf32, #tpu.memory_space<vmem>>, vector<8x72xf32>
    %c1_49 = arith.constant 1 : index
    %c0_50 = arith.constant 0 : index
    %c0_51 = arith.constant 0 : index
    %45 = vector.load %arg7[%c1_49, %c0_50, %c0_51] : memref<5x72x128xf32, #tpu.memory_space<vmem>>, vector<1x72x128xf32>
    %46 = vector.shape_cast %45 : vector<1x72x128xf32> to vector<72x128xf32>
    %cst_52 = arith.constant dense<0.000000e+00> : vector<8x128xf32>
    %47 = tpu.matmul %44, %46, %cst_52 {dimension_numbers = #tpu.dot_dimension_numbers<[1], [0], [0], [1], [0, 0, 1, 1], [], []>} : vector<8x72xf32>, vector<72x128xf32>, vector<8x128xf32> -> vector<8x128xf32>
    %48 = arith.addf %43, %47 : vector<8x128xf32>
    %c2_53 = arith.constant 2 : index
    %c0_54 = arith.constant 0 : index
    %49 = vector.load %arg20[%c2_53, %c0_54] : memref<12x72xf32, #tpu.memory_space<vmem>>, vector<8x72xf32>
    %c2_55 = arith.constant 2 : index
    %c0_56 = arith.constant 0 : index
    %c0_57 = arith.constant 0 : index
    %50 = vector.load %arg7[%c2_55, %c0_56, %c0_57] : memref<5x72x128xf32, #tpu.memory_space<vmem>>, vector<1x72x128xf32>
    %51 = vector.shape_cast %50 : vector<1x72x128xf32> to vector<72x128xf32>
    %cst_58 = arith.constant dense<0.000000e+00> : vector<8x128xf32>
    %52 = tpu.matmul %49, %51, %cst_58 {dimension_numbers = #tpu.dot_dimension_numbers<[1], [0], [0], [1], [0, 0, 1, 1], [], []>} : vector<8x72xf32>, vector<72x128xf32>, vector<8x128xf32> -> vector<8x128xf32>
    %53 = arith.addf %48, %52 : vector<8x128xf32>
    %c3_59 = arith.constant 3 : index
    %c0_60 = arith.constant 0 : index
    %54 = vector.load %arg20[%c3_59, %c0_60] : memref<12x72xf32, #tpu.memory_space<vmem>>, vector<8x72xf32>
    %c3_61 = arith.constant 3 : index
    %c0_62 = arith.constant 0 : index
    %c0_63 = arith.constant 0 : index
    %55 = vector.load %arg7[%c3_61, %c0_62, %c0_63] : memref<5x72x128xf32, #tpu.memory_space<vmem>>, vector<1x72x128xf32>
    %56 = vector.shape_cast %55 : vector<1x72x128xf32> to vector<72x128xf32>
    %cst_64 = arith.constant dense<0.000000e+00> : vector<8x128xf32>
    %57 = tpu.matmul %54, %56, %cst_64 {dimension_numbers = #tpu.dot_dimension_numbers<[1], [0], [0], [1], [0, 0, 1, 1], [], []>} : vector<8x72xf32>, vector<72x128xf32>, vector<8x128xf32> -> vector<8x128xf32>
    %58 = arith.addf %53, %57 : vector<8x128xf32>
    %c4_65 = arith.constant 4 : index
    %c0_66 = arith.constant 0 : index
    %59 = vector.load %arg20[%c4_65, %c0_66] : memref<12x72xf32, #tpu.memory_space<vmem>>, vector<8x72xf32>
    %c4_67 = arith.constant 4 : index
    %c0_68 = arith.constant 0 : index
    %c0_69 = arith.constant 0 : index
    %60 = vector.load %arg7[%c4_67, %c0_68, %c0_69] : memref<5x72x128xf32, #tpu.memory_space<vmem>>, vector<1x72x128xf32>
    %61 = vector.shape_cast %60 : vector<1x72x128xf32> to vector<72x128xf32>
    %cst_70 = arith.constant dense<0.000000e+00> : vector<8x128xf32>
    %62 = tpu.matmul %59, %61, %cst_70 {dimension_numbers = #tpu.dot_dimension_numbers<[1], [0], [0], [1], [0, 0, 1, 1], [], []>} : vector<8x72xf32>, vector<72x128xf32>, vector<8x128xf32> -> vector<8x128xf32>
    %63 = arith.addf %58, %62 : vector<8x128xf32>
    %c0_71 = arith.constant 0 : index
    %c0_72 = arith.constant 0 : index
    %64 = vector.load %arg8[%c0_71, %c0_72] : memref<1x128xf32, #tpu.memory_space<vmem>>, vector<1x128xf32>
    %65 = vector.broadcast %64 : vector<1x128xf32> to vector<8x128xf32>
    %66 = arith.addf %63, %65 : vector<8x128xf32>
    %cst_73 = arith.constant 0.000000e+00 : f32
    %67 = vector.broadcast %cst_73 : f32 to vector<8x128xf32>
    %68 = arith.maximumf %66, %67 : vector<8x128xf32>
    %c0_74 = arith.constant 0 : index
    %c0_75 = arith.constant 0 : index
    %69 = vector.load %arg9[%c0_74, %c0_75] : memref<128x64xf32, #tpu.memory_space<vmem>>, vector<128x64xf32>
    %cst_76 = arith.constant dense<0.000000e+00> : vector<8x64xf32>
    %70 = tpu.matmul %68, %69, %cst_76 {dimension_numbers = #tpu.dot_dimension_numbers<[1], [0], [0], [1], [0, 0, 1, 1], [], []>} : vector<8x128xf32>, vector<128x64xf32>, vector<8x64xf32> -> vector<8x64xf32>
    %c0_77 = arith.constant 0 : index
    %c0_78 = arith.constant 0 : index
    %71 = vector.load %arg10[%c0_77, %c0_78] : memref<128x64xf32, #tpu.memory_space<vmem>>, vector<128x64xf32>
    %cst_79 = arith.constant dense<0.000000e+00> : vector<8x64xf32>
    %72 = tpu.matmul %68, %71, %cst_79 {dimension_numbers = #tpu.dot_dimension_numbers<[1], [0], [0], [1], [0, 0, 1, 1], [], []>} : vector<8x128xf32>, vector<128x64xf32>, vector<8x64xf32> -> vector<8x64xf32>
    %73 = arith.maximumf %70, %72 : vector<8x64xf32>
    %c0_80 = arith.constant 0 : index
    %c0_81 = arith.constant 0 : index
    %74 = vector.load %arg11[%c0_80, %c0_81] : memref<4x8xf32, #tpu.memory_space<vmem>>, vector<4x8xf32>
    %cst_82 = arith.constant dense<0.000000e+00> : vector<4x64xf32>
    %75 = tpu.matmul %74, %73, %cst_82 {dimension_numbers = #tpu.dot_dimension_numbers<[1], [0], [0], [1], [0, 0, 1, 1], [], []>} : vector<4x8xf32>, vector<8x64xf32>, vector<4x64xf32> -> vector<4x64xf32>
    %c0_83 = arith.constant 0 : index
    %c0_84 = arith.constant 0 : index
    %76 = vector.load %arg12[%c0_83, %c0_84] : memref<4x8xf32, #tpu.memory_space<vmem>>, vector<4x8xf32>
    %cst_85 = arith.constant dense<0.000000e+00> : vector<4x64xf32>
    %77 = tpu.matmul %76, %73, %cst_85 {dimension_numbers = #tpu.dot_dimension_numbers<[1], [0], [0], [1], [0, 0, 1, 1], [], []>} : vector<4x8xf32>, vector<8x64xf32>, vector<4x64xf32> -> vector<4x64xf32>
    %78 = arith.maximumf %75, %77 : vector<4x64xf32>
    %c0_86 = arith.constant 0 : index
    %c0_87 = arith.constant 0 : index
    %79 = vector.load %arg21[%c0_86, %c0_87] : memref<4x64xf32, #tpu.memory_space<vmem>>, vector<4x64xf32>
    tpu.vector_store %arg21[%c0_86, %c0_87], %78 {strides = array<i32>} : memref<4x64xf32, #tpu.memory_space<vmem>>, vector<4x64xf32>,
    %c0_88 = arith.constant 0 : index
    %c0_89 = arith.constant 0 : index
    %80 = vector.load %arg21[%c0_88, %c0_89] : memref<4x64xf32, #tpu.memory_space<vmem>>, vector<1x64xf32>
    %c0_90 = arith.constant 0 : index
    %c0_91 = arith.constant 0 : index
    %c0_92 = arith.constant 0 : index
    %81 = vector.load %arg13[%c0_90, %c0_91, %c0_92] : memref<4x64x64xf32, #tpu.memory_space<vmem>>, vector<1x64x64xf32>
    %82 = vector.shape_cast %81 : vector<1x64x64xf32> to vector<64x64xf32>
    %cst_93 = arith.constant dense<0.000000e+00> : vector<1x64xf32>
    %83 = tpu.matmul %80, %82, %cst_93 {dimension_numbers = #tpu.dot_dimension_numbers<[1], [0], [0], [1], [0, 0, 1, 1], [], []>} : vector<1x64xf32>, vector<64x64xf32>, vector<1x64xf32> -> vector<1x64xf32>
    %c1_94 = arith.constant 1 : index
    %c0_95 = arith.constant 0 : index
    %84 = vector.load %arg21[%c1_94, %c0_95] : memref<4x64xf32, #tpu.memory_space<vmem>>, vector<1x64xf32>
    %c1_96 = arith.constant 1 : index
    %c0_97 = arith.constant 0 : index
    %c0_98 = arith.constant 0 : index
    %85 = vector.load %arg13[%c1_96, %c0_97, %c0_98] : memref<4x64x64xf32, #tpu.memory_space<vmem>>, vector<1x64x64xf32>
    %86 = vector.shape_cast %85 : vector<1x64x64xf32> to vector<64x64xf32>
    %cst_99 = arith.constant dense<0.000000e+00> : vector<1x64xf32>
    %87 = tpu.matmul %84, %86, %cst_99 {dimension_numbers = #tpu.dot_dimension_numbers<[1], [0], [0], [1], [0, 0, 1, 1], [], []>} : vector<1x64xf32>, vector<64x64xf32>, vector<1x64xf32> -> vector<1x64xf32>
    %88 = arith.addf %83, %87 : vector<1x64xf32>
    %c2_100 = arith.constant 2 : index
    %c0_101 = arith.constant 0 : index
    %89 = vector.load %arg21[%c2_100, %c0_101] : memref<4x64xf32, #tpu.memory_space<vmem>>, vector<1x64xf32>
    %c2_102 = arith.constant 2 : index
    %c0_103 = arith.constant 0 : index
    %c0_104 = arith.constant 0 : index
    %90 = vector.load %arg13[%c2_102, %c0_103, %c0_104] : memref<4x64x64xf32, #tpu.memory_space<vmem>>, vector<1x64x64xf32>
    %91 = vector.shape_cast %90 : vector<1x64x64xf32> to vector<64x64xf32>
    %cst_105 = arith.constant dense<0.000000e+00> : vector<1x64xf32>
    %92 = tpu.matmul %89, %91, %cst_105 {dimension_numbers = #tpu.dot_dimension_numbers<[1], [0], [0], [1], [0, 0, 1, 1], [], []>} : vector<1x64xf32>, vector<64x64xf32>, vector<1x64xf32> -> vector<1x64xf32>
    %93 = arith.addf %88, %92 : vector<1x64xf32>
    %c3_106 = arith.constant 3 : index
    %c0_107 = arith.constant 0 : index
    %94 = vector.load %arg21[%c3_106, %c0_107] : memref<4x64xf32, #tpu.memory_space<vmem>>, vector<1x64xf32>
    %c3_108 = arith.constant 3 : index
    %c0_109 = arith.constant 0 : index
    %c0_110 = arith.constant 0 : index
    %95 = vector.load %arg13[%c3_108, %c0_109, %c0_110] : memref<4x64x64xf32, #tpu.memory_space<vmem>>, vector<1x64x64xf32>
    %96 = vector.shape_cast %95 : vector<1x64x64xf32> to vector<64x64xf32>
    %cst_111 = arith.constant dense<0.000000e+00> : vector<1x64xf32>
    %97 = tpu.matmul %94, %96, %cst_111 {dimension_numbers = #tpu.dot_dimension_numbers<[1], [0], [0], [1], [0, 0, 1, 1], [], []>} : vector<1x64xf32>, vector<64x64xf32>, vector<1x64xf32> -> vector<1x64xf32>
    %98 = arith.addf %93, %97 : vector<1x64xf32>
    %c0_112 = arith.constant 0 : index
    %c0_113 = arith.constant 0 : index
    %99 = vector.load %arg14[%c0_112, %c0_113] : memref<1x64xf32, #tpu.memory_space<vmem>>, vector<1x64xf32>
    %100 = arith.addf %98, %99 : vector<1x64xf32>
    %cst_114 = arith.constant 0.000000e+00 : f32
    %101 = vector.broadcast %cst_114 : f32 to vector<1x64xf32>
    %102 = arith.maximumf %100, %101 : vector<1x64xf32>
    %c0_115 = arith.constant 0 : index
    %c0_116 = arith.constant 0 : index
    %103 = vector.load %arg15[%c0_115, %c0_116] : memref<64x2xf32, #tpu.memory_space<vmem>>, vector<64x2xf32>
    %cst_117 = arith.constant dense<0.000000e+00> : vector<1x2xf32>
    %104 = tpu.matmul %102, %103, %cst_117 {dimension_numbers = #tpu.dot_dimension_numbers<[1], [0], [0], [1], [0, 0, 1, 1], [], []>} : vector<1x64xf32>, vector<64x2xf32>, vector<1x2xf32> -> vector<1x2xf32>
    %c0_118 = arith.constant 0 : index
    %c0_119 = arith.constant 0 : index
    %105 = vector.load %arg16[%c0_118, %c0_119] : memref<1x2xf32, #tpu.memory_space<vmem>>, vector<1x2xf32>
    %106 = arith.addf %104, %105 : vector<1x2xf32>
    %107 = tpu.iota {dimensions = array<i32: 1>} : vector<1x2xi32>
    %c0_i32 = arith.constant 0 : i32
    %108 = vector.broadcast %c0_i32 : i32 to vector<1x2xi32>
    %109 = arith.cmpi eq, %107, %108 : vector<1x2xi32>
    %cst_120 = arith.constant 1.000000e+00 : f32
    %cst_121 = arith.constant 2.000000e+00 : f32
    %110 = vector.broadcast %cst_120 : f32 to vector<1x2xf32>
    %111 = vector.broadcast %cst_121 : f32 to vector<1x2xf32>
    %112 = arith.select %109, %110, %111 : vector<1x2xi1>, vector<1x2xf32>
    %113 = arith.mulf %106, %112 : vector<1x2xf32>
    %cst_122 = arith.constant 0.318309873 : f32
    %114 = vector.broadcast %cst_122 : f32 to vector<1x2xf32>
    %115 = arith.mulf %113, %114 : vector<1x2xf32>
    %cst_123 = arith.constant 5.000000e-01 : f32
    %116 = vector.broadcast %cst_123 : f32 to vector<1x2xf32>
    %117 = arith.addf %115, %116 : vector<1x2xf32>
    %118 = arith.fptosi %117 : vector<1x2xf32> to vector<1x2xi32>
    %119 = arith.sitofp %118 : vector<1x2xi32> to vector<1x2xf32>
    %120 = arith.cmpf olt, %117, %119 : vector<1x2xf32>
    %cst_124 = arith.constant 1.000000e+00 : f32
    %cst_125 = arith.constant 0.000000e+00 : f32
    %121 = vector.broadcast %cst_124 : f32 to vector<1x2xf32>
    %122 = vector.broadcast %cst_125 : f32 to vector<1x2xf32>
    %123 = arith.select %120, %121, %122 : vector<1x2xi1>, vector<1x2xf32>
    %124 = arith.subf %119, %123 : vector<1x2xf32>
    %cst_126 = arith.constant 3.14159274 : f32
    %125 = vector.broadcast %cst_126 : f32 to vector<1x2xf32>
    %126 = arith.mulf %124, %125 : vector<1x2xf32>
    %127 = arith.subf %113, %126 : vector<1x2xf32>
    %cst_127 = arith.constant 5.000000e-01 : f32
    %128 = vector.broadcast %cst_127 : f32 to vector<1x2xf32>
    %129 = arith.mulf %124, %128 : vector<1x2xf32>
    %130 = arith.fptosi %129 : vector<1x2xf32> to vector<1x2xi32>
    %131 = arith.sitofp %130 : vector<1x2xi32> to vector<1x2xf32>
    %132 = arith.cmpf olt, %129, %131 : vector<1x2xf32>
    %cst_128 = arith.constant 1.000000e+00 : f32
    %cst_129 = arith.constant 0.000000e+00 : f32
    %133 = vector.broadcast %cst_128 : f32 to vector<1x2xf32>
    %134 = vector.broadcast %cst_129 : f32 to vector<1x2xf32>
    %135 = arith.select %132, %133, %134 : vector<1x2xi1>, vector<1x2xf32>
    %136 = arith.subf %131, %135 : vector<1x2xf32>
    %137 = arith.subf %129, %136 : vector<1x2xf32>
    %cst_130 = arith.constant 4.000000e+00 : f32
    %138 = vector.broadcast %cst_130 : f32 to vector<1x2xf32>
    %139 = arith.mulf %138, %137 : vector<1x2xf32>
    %cst_131 = arith.constant 1.000000e+00 : f32
    %140 = vector.broadcast %cst_131 : f32 to vector<1x2xf32>
    %141 = arith.subf %140, %139 : vector<1x2xf32>
    %142 = arith.mulf %127, %127 : vector<1x2xf32>
    %cst_132 = arith.constant -2.50521079E-8 : f32
    %143 = vector.broadcast %cst_132 : f32 to vector<1x2xf32>
    %144 = arith.mulf %142, %143 : vector<1x2xf32>
    %cst_133 = arith.constant 2.75573188E-6 : f32
    %145 = vector.broadcast %cst_133 : f32 to vector<1x2xf32>
    %146 = arith.addf %145, %144 : vector<1x2xf32>
    %147 = arith.mulf %142, %146 : vector<1x2xf32>
    %cst_134 = arith.constant -1.98412701E-4 : f32
    %148 = vector.broadcast %cst_134 : f32 to vector<1x2xf32>
    %149 = arith.addf %148, %147 : vector<1x2xf32>
    %150 = arith.mulf %142, %149 : vector<1x2xf32>
    %cst_135 = arith.constant 0.00833333377 : f32
    %151 = vector.broadcast %cst_135 : f32 to vector<1x2xf32>
    %152 = arith.addf %151, %150 : vector<1x2xf32>
    %153 = arith.mulf %142, %152 : vector<1x2xf32>
    %cst_136 = arith.constant -0.166666672 : f32
    %154 = vector.broadcast %cst_136 : f32 to vector<1x2xf32>
    %155 = arith.addf %154, %153 : vector<1x2xf32>
    %156 = arith.mulf %142, %155 : vector<1x2xf32>
    %cst_137 = arith.constant 1.000000e+00 : f32
    %157 = vector.broadcast %cst_137 : f32 to vector<1x2xf32>
    %158 = arith.addf %157, %156 : vector<1x2xf32>
    %159 = arith.mulf %127, %158 : vector<1x2xf32>
    %160 = arith.mulf %141, %159 : vector<1x2xf32>
    %c0_i32_138 = arith.constant 0 : i32
    %161 = vector.broadcast %c0_i32_138 : i32 to vector<1x2xi32>
    %162 = arith.cmpi eq, %107, %161 : vector<1x2xi32>
    %163 = arith.extui %162 : vector<1x2xi1> to vector<1x2xi32>
    %164 = arith.sitofp %163 : vector<1x2xi32> to vector<1x2xf32>
    %165 = arith.mulf %160, %164 : vector<1x2xf32>
    %cst_139 = arith.constant dense<0.000000e+00> : vector<1xf32>
    %166 = vector.multi_reduction <add>, %165, %cst_139 [1] : vector<1x2xf32> to vector<1xf32>
    %167 = vector.shape_cast %166 : vector<1xf32> to vector<1x1xf32>
    %c1_i32 = arith.constant 1 : i32
    %168 = vector.broadcast %c1_i32 : i32 to vector<1x2xi32>
    %169 = arith.cmpi eq, %107, %168 : vector<1x2xi32>
    %170 = arith.extui %169 : vector<1x2xi1> to vector<1x2xi32>
    %171 = arith.sitofp %170 : vector<1x2xi32> to vector<1x2xf32>
    %172 = arith.mulf %160, %171 : vector<1x2xf32>
    %cst_140 = arith.constant dense<0.000000e+00> : vector<1xf32>
    %173 = vector.multi_reduction <add>, %172, %cst_140 [1] : vector<1x2xf32> to vector<1xf32>
    %174 = vector.shape_cast %173 : vector<1xf32> to vector<1x1xf32>
    %175 = arith.mulf %167, %174 : vector<1x1xf32>
    %176 = tpu.iota {dimensions = array<i32: 1>} : vector<1x4xi32>
    %c0_i32_141 = arith.constant 0 : i32
    %177 = vector.broadcast %c0_i32_141 : i32 to vector<1x4xi32>
    %178 = arith.cmpi eq, %176, %177 : vector<1x4xi32>
    %c3_i32 = arith.constant 3 : i32
    %179 = vector.broadcast %c3_i32 : i32 to vector<1x4xi32>
    %180 = arith.cmpi eq, %176, %179 : vector<1x4xi32>
    %181 = arith.ori %178, %180 : vector<1x4xi1>
    %cst_142 = arith.constant 1.000000e+00 : f32
    %cst_143 = arith.constant -1.000000e+00 : f32
    %182 = vector.broadcast %cst_142 : f32 to vector<1x4xf32>
    %183 = vector.broadcast %cst_143 : f32 to vector<1x4xf32>
    %184 = arith.select %181, %182, %183 : vector<1x4xi1>, vector<1x4xf32>
    %cst_144 = arith.constant 2.500000e-01 : f32
    %185 = vector.broadcast %cst_144 : f32 to vector<1x1xf32>
    %186 = arith.mulf %185, %175 : vector<1x1xf32>
    %187 = vector.broadcast %186 : vector<1x1xf32> to vector<1x4xf32>
    %188 = arith.mulf %187, %184 : vector<1x4xf32>
    %cst_145 = arith.constant 2.500000e-01 : f32
    %189 = vector.broadcast %cst_145 : f32 to vector<1x4xf32>
    %190 = arith.addf %189, %188 : vector<1x4xf32>
    %c0_146 = arith.constant 0 : index
    %c0_147 = arith.constant 0 : index
    %191 = vector.load %arg17[%c0_146, %c0_147] : memref<4x2xf32, #tpu.memory_space<vmem>>, vector<4x2xf32>
    %cst_148 = arith.constant dense<0.000000e+00> : vector<1x2xf32>
    %192 = tpu.matmul %190, %191, %cst_148 {dimension_numbers = #tpu.dot_dimension_numbers<[1], [0], [0], [1], [0, 0, 1, 1], [], []>} : vector<1x4xf32>, vector<4x2xf32>, vector<1x2xf32> -> vector<1x2xf32>
    %c0_149 = arith.constant 0 : index
    %c0_150 = arith.constant 0 : index
    %193 = vector.load %arg18[%c0_149, %c0_150] : memref<1x2xf32, #tpu.memory_space<vmem>>, vector<1x2xf32>
    %194 = arith.addf %192, %193 : vector<1x2xf32>
    %c0_151 = arith.constant 0 : index
    %c0_152 = arith.constant 0 : index
    %195 = vector.load %arg19[%c0_151, %c0_152] : memref<1x2xf32, #tpu.memory_space<vmem>>, vector<1x2xf32>
    tpu.vector_store %arg19[%c0_151, %c0_152], %194 {strides = array<i32>} : memref<1x2xf32, #tpu.memory_space<vmem>>, vector<1x2xf32>,
    return
  }
}

</mosaic_0001>

<bundles_post_ra>
// kernel: net_forward.1
= control target key start
LH: loop header
LB: loop body
LE: loop exit
PB: predicated region body
PF: predicated region fallthrough
CT: control target
= control target key end

     0   :  { %s4176_s0 = inlined_call_operand.vmem [shape: f32[28,28], index: 0, kind: input, shape index: {}]   ;;  %s4177_s1 = inlined_call_operand.hbm [shape: f32[5,28,144], index: 1, kind: input, shape index: {}]   ;;  %s4178_s2 = inlined_call_operand.vmem [shape: f32[1,144], index: 2, kind: input, shape index: {}]   ;;  %s4179_s3 = inlined_call_operand.vmem [shape: f32[144,72], index: 3, kind: input, shape index: {}]   ;;  %s4180_s4 = inlined_call_operand.hbm [shape: f32[144,72], index: 4, kind: input, shape index: {}]   ;;  %s4181_s5 = inlined_call_operand.vmem [shape: f32[12,24], index: 5, kind: input, shape index: {}]   ;;  %s4182_s6 = inlined_call_operand.vmem [shape: f32[12,24], index: 6, kind: input, shape index: {}]   ;;  %s4183_s7 = inlined_call_operand.vmem [shape: f32[5,72,128], index: 7, kind: input, shape index: {}]   ;;  %s4184_s8 = inlined_call_operand.hbm [shape: f32[1,128], index: 8, kind: input, shape index: {}]   ;;  %s4185_s9 = inlined_call_operand.vmem [shape: f32[128,64], index: 9, kind: input, shape index: {}]   ;;  %s4186_s10 = inlined_call_operand.vmem [shape: f32[128,64], index: 10, kind: input, shape index: {}]   ;;  %s4187_s11 = inlined_call_operand.vmem [shape: f32[4,8], index: 11, kind: input, shape index: {}]   ;;  %s4188_s12 = inlined_call_operand.vmem [shape: f32[4,8], index: 12, kind: input, shape index: {}]   ;;  %s4189_s13 = inlined_call_operand.hbm [shape: f32[4,64,64], index: 13, kind: input, shape index: {}]   ;;  %s4190_s14 = inlined_call_operand.vmem [shape: f32[1,64], index: 14, kind: input, shape index: {}]   ;;  %s4191_s15 = inlined_call_operand.vmem [shape: f32[64,2], index: 15, kind: input, shape index: {}]   ;;  %s4192_s16 = inlined_call_operand.vmem [shape: f32[1,2], index: 16, kind: input, shape index: {}]   ;;  %s4193_s17 = inlined_call_operand.vmem [shape: f32[4,2], index: 17, kind: input, shape index: {}]   ;;  %s4194_s18 = inlined_call_operand.vmem [shape: f32[1,2], index: 18, kind: input, shape index: {}]   ;;  %s4195_s19 = inlined_call_operand.hbm [shape: f32[1,2], index: 19, kind: output, shape index: {}]  }
   0x1   :  { %4202 = sst [smem:[#allocation17_spill]] %s4176_s0 }
   0x2   :  { %4203 = sst [smem:[#allocation18_spill]] %s4177_s1 }
   0x3   :  { %4204 = sst [smem:[#allocation19_spill]] %s4178_s2 }
   0x4   :  { %4205 = sst [smem:[#allocation20_spill]] %s4179_s3 }
   0x5   :  { %4206 = sst [smem:[#allocation21_spill]] %s4195_s19 }
   0x6   :  { %24 = vsyncpa [#allocation5], 0 }
   0x7   :  { %25 = vsyncpa [#allocation8], 0 }
   0x8   :  { %26 = vsyncpa [#allocation11], 0 }
   0x9   :  { %27 = vsyncpa [#allocation6], 0  ;;  %s3397_s0 = smov [#allocation7]   ;;  %s3279_s1 = scalar_lea.hbm %s4180_s4, 2304 }
   0xa   :  { %s51_s30 = sshll.u32 %s3397_s0, 4  ;;  %p3280_p0 = scmp.ne.s32.totalorder %s4180_s4, %s3279_s1  ;;  %s52_s30 = int_to_ptr.vmem [resolvable:$true] %s51_s30 }
   0xb   :  { %p3283_p1 = scmp.lt.u32.totalorder %s3279_s1, %s4180_s4 }
   0xd   :  { %p3285_p2 = pnand %p3283_p1, %p3280_p0 }
   0xf   :  { %3288 = shalt.err (!%p3285_p2)
}
  0x10   :  { %s3289_s25 = scalar_lea.vmem %s52_s30, 2304  ;;  %p3294_p4 = scmp.lt.s32.totalorder %s52_s30, %s52_s30 }
  0x11   :  { %p3290_p3 = scmp.ne.s32.totalorder %s52_s30, %s3289_s25  ;;  %p3295_p5 = scmp.lt.s32.totalorder %s3289_s25, %s3289_s25 }
  0x13   :  { %p3296_p6 = por %p3295_p5, %p3294_p4 }
  0x15   :  { %p3297_p7 = pnand %p3296_p6, %p3290_p3 }
  0x17   :  { %3300 = shalt.err (!%p3297_p7)
}
  0x18   :  { %s4200_s3 = smov 128   ;;  %s4201_s26 = smov 8  }
  0x19   :  { %57 = dma.hbm_to_vmem [thread:$0]  %s4180_s4, 2304, %s52_s30, [#allocation8], %s4200_s3, %s4200_s3, %s4201_s26  }
  0x1a   :  { %s3400_s29 = smov [#allocation4]   ;;  %s4207_s1 = sld [smem:[#allocation18_spill]] }
  0x1b   :  { %s35_s0 = sshll.u32 %s3400_s29, 4  ;;  %s36_s0 = int_to_ptr.vmem [resolvable:$true] %s35_s0 }
  0x20   :  { %s3301_s22 = scalar_lea.hbm %s4207_s1, 5120 }
  0x21   :  { %p3302_p8 = scmp.ne.s32.totalorder %s4207_s1, %s3301_s22  ;;  %p3305_p9 = scmp.lt.u32.totalorder %s3301_s22, %s4207_s1 }
  0x23   :  { %p3307_p10 = pnand %p3305_p9, %p3302_p8 }
  0x25   :  { %3310 = shalt.err (!%p3307_p10)
}
  0x26   :  { %s3311_s19 = scalar_lea.vmem %s36_s0, 5120  ;;  %p3316_p12 = scmp.lt.s32.totalorder %s36_s0, %s36_s0 }
  0x27   :  { %p3312_p11 = scmp.ne.s32.totalorder %s36_s0, %s3311_s19  ;;  %p3317_p13 = scmp.lt.s32.totalorder %s3311_s19, %s3311_s19 }
  0x29   :  { %p3318_p0 = por %p3317_p13, %p3316_p12 }
  0x2b   :  { %p3319_p1 = pnand %p3318_p0, %p3312_p11 }
  0x2d   :  { %3322 = shalt.err (!%p3319_p1)
}
  0x2e   :  { %s3401_s4 = smov 256   ;;  %s3402_s30 = smov 16  }
  0x2f   :  { %41 = dma.hbm_to_vmem [thread:$0]  %s4207_s1, 5120, %s36_s0, [#allocation5], %s3401_s4, %s3401_s4, %s3402_s30  }
  0x30   :  { %s3403_s29 = smov [#allocation9]   ;;  %s3404_s21 = smov [#allocation10]  }
  0x31   :  { %s70_s20 = sshll.u32 %s3403_s29, 4  ;;  %s87_s2 = sshll.u32 %s3404_s21, 4  ;;  %s71_s20 = int_to_ptr.vmem [resolvable:$true] %s70_s20  ;;  %s3539_s2 = int_to_ptr.vmem [resolvable:$true] %s87_s2 }
  0x32   :  { %s3323_s19 = scalar_lea.hbm %s4184_s8, 16 }
  0x33   :  { %p3324_p2 = scmp.ne.s32.totalorder %s4184_s8, %s3323_s19  ;;  %p3327_p3 = scmp.lt.u32.totalorder %s3323_s19, %s4184_s8 }
  0x35   :  { %p3329_p4 = pnand %p3327_p3, %p3324_p2 }
  0x37   :  { %3332 = shalt.err (!%p3329_p4)
}
  0x38   :  { %s3333_s0 = scalar_lea.vmem %s71_s20, 16  ;;  %s3337_s1 = scalar_lea.vmem %s71_s20, 32 }
  0x39   :  { %p3334_p5 = scmp.ne.s32.totalorder %s71_s20, %s3333_s0  ;;  %p3338_p6 = scmp.lt.s32.totalorder %s71_s20, %s71_s20 }
  0x3a   :  { %p3339_p7 = scmp.lt.s32.totalorder %s3337_s1, %s3333_s0 }
  0x3c   :  { %p3340_p8 = por %p3339_p7, %p3338_p6 }
  0x3e   :  { %p3341_p9 = pnand %p3340_p8, %p3334_p5 }
  0x40   :  { %3344 = shalt.err (!%p3341_p9)
}
  0x41   :  { %73 = dma.hbm_to_vmem [thread:$0]  %s4184_s8, 16, %s71_s20, [#allocation8]  }
  0x42   :  { %s3345_s29 = scalar_lea.hbm %s4189_s13, 4096 }
  0x43   :  { %p3346_p10 = scmp.ne.s32.totalorder %s4189_s13, %s3345_s29  ;;  %p3349_p11 = scmp.lt.u32.totalorder %s3345_s29, %s4189_s13 }
  0x45   :  { %p3351_p12 = pnand %p3349_p11, %p3346_p10 }
  0x47   :  { %3354 = shalt.err (!%p3351_p12)
}
  0x48   :  { %s3355_s23 = scalar_lea.vmem %s3539_s2, 4096  ;;  %p3360_p0 = scmp.lt.s32.totalorder %s3539_s2, %s3539_s2 }
  0x49   :  { %p3356_p13 = scmp.ne.s32.totalorder %s3539_s2, %s3355_s23  ;;  %p3361_p1 = scmp.lt.s32.totalorder %s3355_s23, %s3355_s23 }
  0x4b   :  { %p3362_p2 = por %p3361_p1, %p3360_p0 }
  0x4d   :  { %p3363_p3 = pnand %p3362_p2, %p3356_p13 }
  0x4f   :  { %3366 = shalt.err (!%p3363_p3)
}
  0x50   :  { %s4208_s8 = smov 8   ;;  %s4209_s20 = smov 128  }
  0x51   :  { %93 = dma.hbm_to_vmem [thread:$0]  %s4189_s13, 4096, %s3539_s2, [#allocation11], %s4209_s20, %s4209_s20, %s4208_s8  }
  0x52   :  { %3389 = dma.done.wait [#allocation5], 5120  }
  0x53   :  { %3390 = vsyncadd [#allocation5], 4294962176 }
  0x54   :  { %3391 = dma.done.wait [#allocation8], 2320  }
  0x55   :  { %3392 = vsyncadd [#allocation8], 4294964976 }
  0x56   :  { %3393 = dma.done.wait [#allocation11], 4096  }
  0x57   :  { %3394 = vsyncadd [#allocation11], 4294963200  ;;  %v3405_v0 = vmov 0.0   ;;  %v3406_v1 = vmov 0.0|0.0   ;;  %vm149_vm0 = vcmask 1043456   ;;  %v132_v2 = vld [vmem:[#allocation4 + $0x48] sm:$0xff] }
  0x58   :  { %220 = vmatprep.mubr.f32.mxu0 %v3405_v0  ;;  %3006 = vmatprep.subr.bf16.mxu1 %v3406_v1  ;;  %v134_v3 = vld [vmem:[#allocation4 + $0x58] sm:$0xff]  ;;  %v131_v4 = vld [vmem:[#allocation4 + $0x40] sm:$0xff]  ;;  %v133_v6 = vld [vmem:[#allocation4 + $0x50] sm:$0xff]  ;;  %vm3407_vm1 = vmmov 1   ;;  %s4212_s25 = sld [smem:[#allocation17_spill]]  ;;  %vm139_vm3 = vcmask 228352  }
  0x59   :  { %v2956_v5 = vpack.c.bf16 %v134_v3, %v132_v2  ;;  %v136_v7 = vld [vmem:[#allocation4 + $0x68] sm:$0xff]  ;;  %v138_v8 = vld [vmem:[#allocation4 + $0x78] sm:$0xf]  ;;  %v2958_v9 = vpack.c.bf16 %v133_v6, %v131_v4  ;;  %vm3576_vm2 = vmpackc.low %vm149_vm0, %vm3407_vm1  ;;  %s4213_s29 = sld [smem:[#allocation20_spill]]  ;;  %s4214_s24 = sld [smem:[#allocation19_spill]]  ;;  %vm727_vm4 = vcmask 130048  }
  0x5a   :  { %v2960_v10 = vpack.c.bf16 %v138_v8, %v136_v7  ;;  %v135_v12 = vld [vmem:[#allocation4 + $0x60] sm:$0xff]  ;;  %v137_v13 = vld [vmem:[#allocation4 + $0x70] sm:$0xf]  ;;  %v120_v14 = vld [vmem:[#allocation4 + $0x8] sm:$0xff]  ;;  %vm920_vm5 = vcmask 195584   ;;  %vm3408_vm6 = vmmov 0  }
  0x5b   :  { %2957 = vmatprep.subr.bf16.mxu0 %v2956_v5  ;;  %v122_v15 = vld [vmem:[#allocation4 + $0x18] sm:$0xff]  ;;  %v2963_v16 = vpack.c.bf16 %v137_v13, %v135_v12  ;;  %v119_v18 = vld [vmem:[#allocation4] sm:$0xff]  ;;  %v121_v19 = vld [vmem:[#allocation4 + $0x10] sm:$0xff]  ;;  %vm1089_vm7 = vcmask 584704   ;;  %vm1087_vm8 = vcmask 588800   ;;  %vm1696_vm9 = vcmask 64512  }
  0x5c   :  { %2959 = vmatpush1.bf16.msra.mxu0 %v2958_v9  ;;  %v2966_v17 = vpack.c.bf16 %v122_v15, %v120_v14  ;;  %v124_v20 = vld [vmem:[#allocation4 + $0x28] sm:$0xff]  ;;  %v126_v21 = vld [vmem:[#allocation4 + $0x38] sm:$0xf]  ;;  %v2968_v23 = vpack.c.bf16 %v121_v19, %v119_v18  ;;  %v123_v25 = vld [vmem:[#allocation4 + $0x20] sm:$0xff]  ;;  %vm1845_vm10 = vcmask 519168   ;;  %vm1866_vm11 = vcmask 523264  }
  0x5d   :  { %2962 = vmatprep.subr.msk.bf16.mxu0 %vm3576_vm2, %v2960_v10  ;;  %v2970_v24 = vpack.c.bf16 %v126_v21, %v124_v20  ;;  %v125_v26 = vld [vmem:[#allocation4 + $0x30] sm:$0xf]  ;;  %v342_v27 = vld [vmem:[#allocation4 + $0x88] sm:$0xff]  ;;  %v344_v28 = vld [vmem:[#allocation4 + $0x98] sm:$0xff]  ;;  %vm2305_vm1 = vcmask 8192  }
  0x5e   :  { %v127_v22 = vld [vmem:[%s4212_s25 + $0x1] sm:$0xff]  ;;  %v128_v29 = vld [vmem:[%s4212_s25 + $0x9] sm:$0xff]  ;;  %v2973_v30 = vpack.c.bf16 %v125_v26, %v123_v25  ;;  %v2976_v31 = vpack.c.bf16 %v344_v28, %v342_v27  ;;  %v129_v32 = vld [vmem:[%s4212_s25 + $0x11] sm:$0xff] }
  0x5f   :  { %v341_v33 = vld [vmem:[#allocation4 + $0x80] sm:$0xff]  ;;  %v343_v34 = vld [vmem:[#allocation4 + $0x90] sm:$0xff]  ;;  %v346_v35 = vld [vmem:[#allocation4 + $0xa8] sm:$0xff] }
  0x60   :  { %2965 = vmatpush1.bf16.msk.msra.mxu0 %vm3576_vm2, %v2963_v16  ;;  %v348_v36 = vld [vmem:[#allocation4 + $0xb8] sm:$0xf]  ;;  %v709_v37 = vld [vmem:[%s4213_s29] sm:$0xff]  ;;  %v711_v40 = vld [vmem:[%s4213_s29 + $0x10] sm:$0xff]  ;;  %v2978_v43 = vpack.c.bf16 %v343_v34, %v341_v33 }
  0x61   :  { %2967 = vmatprep.subr.bf16.mxu0 %v2966_v17  ;;  %v710_v38 = vld [vmem:[%s4213_s29 + $0x8] sm:$0xff]  ;;  %v712_v41 = vld [vmem:[%s4213_s29 + $0x18] sm:$0xff]  ;;  %v116_v42 = vld [vmem:[%s4212_s25] sm:$0xff]  ;;  %v2980_v44 = vpack.c.bf16 %v348_v36, %v346_v35 }
  0x62   :  { %v3007_v39 = vpack.c.bf16 %v710_v38, %v709_v37  ;;  %v345_v45 = vld [vmem:[#allocation4 + $0xa0] sm:$0xff]  ;;  %v347_v46 = vld [vmem:[#allocation4 + $0xb0] sm:$0xf]  ;;  %v458_v47 = vld [vmem:[#allocation4 + $0xc8] sm:$0xff]  ;;  %v3010_v48 = vpack.c.bf16 %v712_v41, %v711_v40 }
  0x63   :  { %2422 = vmatmul.mubr.msk.f32.vlgmr.msra.gmra.mrb[0].mxu0 %vm139_vm3, %v127_v22  ;;  %v460_v49 = vld [vmem:[#allocation4 + $0xd8] sm:$0xff]  ;;  %v713_v50 = vld [vmem:[%s4213_s29 + $0x20] sm:$0xff]  ;;  %v2983_v53 = vpack.c.bf16 %v347_v46, %v345_v45  ;;  %v716_v57 = vld [vmem:[%s4213_s29 + $0x38] sm:$0xff] }
  0x64   :  { %226 = vmatprep.mubr.f32.mxu0 %v3405_v0  ;;  %2969 = vmatpush1.bf16.msra.mxu0 %v2968_v23  ;;  %v714_v51 = vld [vmem:[%s4213_s29 + $0x28] sm:$0xff]  ;;  %v2986_v54 = vpack.c.bf16 %v460_v49, %v458_v47  ;;  %v715_v56 = vld [vmem:[%s4213_s29 + $0x30] sm:$0xff]  ;;  %v462_v61 = vld [vmem:[#allocation4 + $0xe8] sm:$0xff] }
  0x65   :  { %2972 = vmatprep.subr.msk.bf16.mxu0 %vm3576_vm2, %v2970_v24  ;;  %3008 = vmatpush1.bf16.msra.mxu1 %v3007_v39  ;;  %v117_v52 = vld [vmem:[%s4212_s25 + $0x8] sm:$0xff]  ;;  %v3013_v55 = vpack.c.bf16 %v714_v51, %v713_v50  ;;  %v118_v58 = vld [vmem:[%s4212_s25 + $0x10] sm:$0xff]  ;;  %v3016_v62 = vpack.c.bf16 %v716_v57, %v715_v56  ;;  %v717_v2 = vld [vmem:[%s4213_s29 + $0x40] sm:$0xff] }
  0x66   :  { %3009 = vmatprep.subr.bf16.mxu1 %v3406_v1  ;;  %v457_v59 = vld [vmem:[#allocation4 + $0xc0] sm:$0xff]  ;;  %v459_v60 = vld [vmem:[#allocation4 + $0xd0] sm:$0xff]  ;;  %v464_v63 = vld [vmem:[#allocation4 + $0xf8] sm:$0xf] }
  0x67   :  { %2423 = vmatmul.mubr.msk.f32.gmra.mrb[2].mxu0 %vm139_vm3, %v128_v29  ;;  %v718_v3 = vld [vmem:[%s4213_s29 + $0x48] sm:$0xff]  ;;  %v2988_v5 = vpack.c.bf16 %v459_v60, %v457_v59  ;;  %v2990_v6 = vpack.c.bf16 %v464_v63, %v462_v61  ;;  %v461_v7 = vld [vmem:[#allocation4 + $0xe0] sm:$0xff]  ;;  %v463_v8 = vld [vmem:[#allocation4 + $0xf0] sm:$0xf] }
  0x68   :  { %232 = vmatprep.mubr.f32.mxu0 %v3405_v0  ;;  %2975 = vmatpush1.bf16.msk.msra.mxu0 %vm3576_vm2, %v2973_v30  ;;  %v337_v4 = vld [vmem:[%s4212_s25 + $0x2] sm:$0xff]  ;;  %v3019_v10 = vpack.c.bf16 %v718_v3, %v717_v2  ;;  %v576_v12 = vld [vmem:[#allocation4 + $0x118] sm:$0xff]  ;;  %v720_v14 = vld [vmem:[%s4213_s29 + $0x58] sm:$0xff]  ;;  %v2993_v16 = vpack.c.bf16 %v463_v8, %v461_v7 }
  0x69   :  { %2977 = vmatprep.subr.bf16.mxu0 %v2976_v31  ;;  %3011 = vmatpush1.bf16.msra.mxu1 %v3010_v48  ;;  %v574_v9 = vld [vmem:[#allocation4 + $0x108] sm:$0xff]  ;;  %v719_v13 = vld [vmem:[%s4213_s29 + $0x50] sm:$0xff]  ;;  %v722_v20 = vld [vmem:[%s4213_s29 + $0x68] sm:$0xff] }
  0x6a   :  { %3012 = vmatprep.subr.bf16.mxu1 %v3406_v1  ;;  %v338_v15 = vld [vmem:[%s4212_s25 + $0xa] sm:$0xff]  ;;  %v2996_v17 = vpack.c.bf16 %v576_v12, %v574_v9  ;;  %v3022_v18 = vpack.c.bf16 %v720_v14, %v719_v13  ;;  %v721_v19 = vld [vmem:[%s4213_s29 + $0x60] sm:$0xff]  ;;  %v339_v21 = vld [vmem:[%s4212_s25 + $0x12] sm:$0xff] }
  0x6b   :  { %2424 = vmatmul.mubr.msk.f32.gmra.mrb[4].mxu0 %vm139_vm3, %v129_v32  ;;  %v573_v22 = vld [vmem:[#allocation4 + $0x100] sm:$0xff]  ;;  %v575_v23 = vld [vmem:[#allocation4 + $0x110] sm:$0xff]  ;;  %v578_v24 = vld [vmem:[#allocation4 + $0x128] sm:$0xff]  ;;  %v3025_v25 = vpack.c.bf16 %v722_v20, %v721_v19 }
  0x6c   :  { %318 = vmatprep.mubr.f32.mxu0 %v3405_v0  ;;  %v580_v26 = vld [vmem:[#allocation4 + $0x138] sm:$0xf]  ;;  %v723_v27 = vld [vmem:[%s4213_s29 + $0x70] sm:$0xff]  ;;  %v724_v28 = vld [vmem:[%s4213_s29 + $0x78] sm:$0xff]  ;;  %v2998_v30 = vpack.c.bf16 %v575_v23, %v573_v22 }
  0x6d   :  { %3014 = vmatpush1.bf16.msra.mxu1 %v3013_v55  ;;  %v453_v29 = vld [vmem:[%s4212_s25 + $0x3] sm:$0xff]  ;;  %v3000_v31 = vpack.c.bf16 %v580_v26, %v578_v24  ;;  %v577_v32 = vld [vmem:[#allocation4 + $0x120] sm:$0xff]  ;;  %v3028_v34 = vpack.c.bf16 %v724_v28, %v723_v27  ;;  %v454_v35 = vld [vmem:[%s4212_s25 + $0xb] sm:$0xff] }
  0x6e   :  { %3015 = vmatprep.subr.bf16.mxu1 %v3406_v1  ;;  %v579_v33 = vld [vmem:[#allocation4 + $0x130] sm:$0xf]  ;;  %v455_v37 = vld [vmem:[%s4212_s25 + $0x13] sm:$0xff]  ;;  %v726_v41 = vld [vmem:[%s4213_s29 + $0x88] sm:$0xff] }
  0x6f   :  { %2427 = vmatmul.mubr.msk.f32.vlgmr.msra.gmra.mrb[0].mxu0 %vm139_vm3, %v116_v42  ;;  %v3003_v36 = vpack.c.bf16 %v579_v33, %v577_v32  ;;  %v569_v38 = vld [vmem:[%s4212_s25 + $0x4] sm:$0xff]  ;;  %v570_v39 = vld [vmem:[%s4212_s25 + $0xc] sm:$0xff]  ;;  %v571_v11 = vld [vmem:[%s4212_s25 + $0x14] sm:$0xff] }
  0x70   :  { %324 = vmatprep.mubr.f32.mxu0 %v3405_v0  ;;  %2979 = vmatpush1.bf16.msra.mxu0 %v2978_v43  ;;  %v725_v40 = vld [vmem:[%s4213_s29 + $0x80] sm:$0xff]  ;;  %v687_v43 = vlaneseq  ;;  %v820_v63 = vld [vmem:[#allocation7 + $0x18] sm:$0xff]  ;;  %v821_v9 = vld [vmem:[#allocation7 + $0x20] sm:$0xff] }
  0x71   :  { %2982 = vmatprep.subr.msk.bf16.mxu0 %vm3576_vm2, %v2980_v44  ;;  %3017 = vmatpush1.bf16.msra.mxu1 %v3016_v62  ;;  %v3031_v42 = vpack.c.bf16 %v726_v41, %v725_v40  ;;  %v685_v46 = vld [vmem:[%s4214_s24] sm:$0x3]  ;;  %v819_v62 = vld [vmem:[#allocation7 + $0x10] sm:$0xff]  ;;  %v825_v19 = vld [vmem:[#allocation7 + $0x40] sm:$0xff] }
  0x72   :  { %3018 = vmatprep.subr.bf16.mxu1 %v3406_v1  ;;  %v688_v44 = vshrl.u32 %v687_v43, 7  ;;  %v826_v20 = vld [vmem:[#allocation7 + $0x48] sm:$0xff]  ;;  %v827_v22 = vld [vmem:[#allocation7 + $0x50] sm:$0xff]  ;;  %v828_v23 = vld [vmem:[#allocation7 + $0x58] sm:$0xff] }
  0x73   :  { %2428 = vmatmul.mubr.msk.f32.gmra.mrb[2].mxu0 %vm139_vm3, %v117_v52  ;;  %v3049_v24 = vpack.c.bf16 %v828_v23, %v827_v22  ;;  %v830_v26 = vld [vmem:[#allocation7 + $0x68] sm:$0xff]  ;;  %v831_v28 = vld [vmem:[#allocation7 + $0x70] sm:$0xff] }
  0x74   :  { %330 = vmatprep.mubr.f32.mxu0 %v3405_v0  ;;  %2985 = vmatpush1.bf16.msk.msra.mxu0 %vm3576_vm2, %v2983_v53  ;;  %v689_v45 = vsub.s32 0, %v688_v44  ;;  %v693_v47 = vsub.s32 1, %v688_v44  ;;  %v817_v53 = vld [vmem:[#allocation7] sm:$0xff]  ;;  %v834_v32 = vld [vmem:[#allocation7 + $0x88] sm:$0xff] }
  0x75   :  { %2987 = vmatprep.subr.bf16.mxu0 %v2986_v54  ;;  %3020 = vmatpush1.bf16.msra.mxu1 %v3019_v10  ;;  %v818_v54 = vld [vmem:[#allocation7 + $0x8] sm:$0xff] }
  0x76   :  { %3021 = vmatprep.subr.bf16.mxu1 %v3406_v1  ;;  %v690_v48 = vrot.slane %v685_v46, %v689_v45  ;;  %v694_v49 = vrot.slane %v685_v46, %v693_v47  ;;  %v822_v10 = vld [vmem:[#allocation7 + $0x28] sm:$0xff] }
  0x77   :  { %2429 = vmatmul.mubr.msk.f32.gmra.mrb[4].mxu0 %vm139_vm3, %v118_v58  ;;  %v3034_v58 = vpack.c.bf16 %v818_v54, %v817_v53  ;;  %v3040_v14 = vpack.c.bf16 %v822_v10, %v821_v9  ;;  %v919_v54 = vld [vmem:[%s4181_s5 + $0x8] sm:$0xf]  ;;  %v2461_v10 = vld [vmem:[%s4183_s7 + $0x78] sm:$0xff] }
  0x78   :  { %428 = vmatprep.mubr.f32.mxu0 %v3405_v0 }
  0x79   :  { %3023 = vmatpush1.bf16.msra.mxu1 %v3022_v18 }
  0x7a   :  { %3024 = vmatprep.subr.bf16.mxu1 %v3406_v1 }
  0x7b   :  { %2432 = vmatmul.mubr.msk.f32.vlgmr.msra.gmra.mrb[0].mxu0 %vm139_vm3, %v337_v4 }
  0x7c   :  { %434 = vmatprep.mubr.f32.mxu0 %v3405_v0  ;;  %2989 = vmatpush1.bf16.msra.mxu0 %v2988_v5  ;;  %v3037_v5 = vpack.c.bf16 %v820_v63, %v819_v62  ;;  %v1094_v62 = vld [vmem:[%s4183_s7 + $0x10] sm:$0xff] }
  0x7d   :  { %2992 = vmatprep.subr.msk.bf16.mxu0 %vm3576_vm2, %v2990_v6  ;;  %3026 = vmatpush1.bf16.msra.mxu1 %v3025_v25  ;;  %v829_v25 = vld [vmem:[#allocation7 + $0x60] sm:$0xff] }
  0x7e   :  { %3027 = vmatprep.subr.bf16.mxu1 %v3406_v1  ;;  %v3052_v27 = vpack.c.bf16 %v830_v26, %v829_v25  ;;  %v2466_v25 = vld [vmem:[%s4183_s7 + $0x90] sm:$0xff]  ;;  %v2467_v26 = vld [vmem:[%s4183_s7 + $0x98] sm:$0xff] }
  0x7f   :  { %2433 = vmatmul.mubr.msk.f32.gmra.mrb[2].mxu0 %vm139_vm3, %v338_v15 }
  0x80   :  { %440 = vmatprep.mubr.f32.mxu0 %v3405_v0  ;;  %2995 = vmatpush1.bf16.msk.msra.mxu0 %vm3576_vm2, %v2993_v16  ;;  %v823_v16 = vld [vmem:[#allocation7 + $0x30] sm:$0xff] }
  0x81   :  { %2997 = vmatprep.subr.bf16.mxu0 %v2996_v17  ;;  %3029 = vmatpush1.bf16.msra.mxu1 %v3028_v34  ;;  %v824_v17 = vld [vmem:[#allocation7 + $0x38] sm:$0xff]  ;;  %v918_v34 = vld [vmem:[%s4181_s5] sm:$0xff] }
  0x82   :  { %3030 = vmatprep.subr.bf16.mxu1 %v3406_v1  ;;  %v3043_v18 = vpack.c.bf16 %v824_v17, %v823_v16  ;;  %v2463_v17 = vld [vmem:[%s4183_s7 + $0x88] sm:$0xff] }
  0x83   :  { %2434 = vmatmul.mubr.msk.f32.gmra.mrb[4].mxu0 %vm139_vm3, %v339_v21  ;;  %v3046_v21 = vpack.c.bf16 %v826_v20, %v825_v19 }
  0x84   :  { %544 = vmatprep.mubr.f32.mxu0 %v3405_v0 }
  0x85   :  { %3032 = vmatpush1.bf16.msra.mxu1 %v3031_v42 }
  0x86   :  { %3033 = vmatprep.subr.bf16.mxu1 %v3406_v1 }
  0x87   :  { %2437 = vmatmul.mubr.msk.f32.vlgmr.msra.gmra.mrb[0].mxu0 %vm139_vm3, %v453_v29  ;;  %v832_v29 = vld [vmem:[#allocation7 + $0x78] sm:$0xff] }
  0x88   :  { %550 = vmatprep.mubr.f32.mxu0 %v3405_v0  ;;  %2999 = vmatpush1.bf16.msra.mxu0 %v2998_v30  ;;  %v3055_v30 = vpack.c.bf16 %v832_v29, %v831_v28  ;;  %v2477_v28 = vld [vmem:[%s4183_s7 + $0xe0] sm:$0xff]  ;;  %v3093_v29 = vpack.c.bf16 %v2467_v26, %v2466_v25  ;;  %v1528_v26 = vld [vmem:[%s4185_s9 + $0x30] sm:$0xff] }
  0x89   :  { %3002 = vmatprep.subr.msk.bf16.mxu0 %vm3576_vm2, %v3000_v31  ;;  %v833_v31 = vld [vmem:[#allocation7 + $0x80] sm:$0xff] }
  0x8a   :  { %v3058_v33 = vpack.c.bf16 %v834_v32, %v833_v31  ;;  %v2468_v31 = vld [vmem:[%s4183_s7 + $0xa0] sm:$0xff]  ;;  %v2469_v32 = vld [vmem:[%s4183_s7 + $0xa8] sm:$0xff] }
  0x8b   :  { %2438 = vmatmul.mubr.msk.f32.gmra.mrb[2].mxu0 %vm139_vm3, %v454_v35  ;;  %v2455_v35 = vld [vmem:[%s4183_s7 + $0x48] sm:$0xff] }
  0x8c   :  { %556 = vmatprep.mubr.f32.mxu0 %v3405_v0  ;;  %3005 = vmatpush1.bf16.msk.msra.mxu0 %vm3576_vm2, %v3003_v36  ;;  %v2456_v36 = vld [vmem:[%s4183_s7 + $0x50] sm:$0xff] }
  0x8f   :  { %2439 = vmatmul.mubr.msk.f32.gmra.mrb[4].mxu0 %vm139_vm3, %v455_v37  ;;  %v3069_v37 = vpack.c.bf16 %v2456_v36, %v2455_v35 }
  0x90   :  { %660 = vmatprep.mubr.f32.mxu0 %v3405_v0 }
  0x93   :  { %2442 = vmatmul.mubr.msk.f32.vlgmr.msra.gmra.mrb[0].mxu0 %vm139_vm3, %v569_v38 }
  0x94   :  { %666 = vmatprep.mubr.f32.mxu0 %v3405_v0 }
  0x97   :  { %2443 = vmatmul.mubr.msk.f32.gmra.mrb[2].mxu0 %vm139_vm3, %v570_v39 }
  0x98   :  { %672 = vmatprep.mubr.f32.mxu0 %v3405_v0 }
  0x9b   :  { %2444 = vmatmul.mubr.msk.f32.gmra.mrb[4].mxu0 %vm139_vm3, %v571_v11 }
  0x9c   :  { %2659 = vmatprep.mubr.msk.f32.mxu0 %vm920_vm5, %v918_v34  ;;  %v2479_v34 = vld [vmem:[%s4183_s7 + $0xf0] sm:$0xff] }
 0x166   :  { %v662_v50 = vpop.f32.mrb[0].mxu0 }
 0x167   :  { %v3741_v51 = vadd.f32 %v690_v48, %v662_v50  ;;  %v664_v52 = vpop.f32.mrb[1].mxu0 }
 0x168   :  { %v698_v55 = vadd.f32 %v694_v49, %v664_v52 }
 0x169   :  { %v703_v59 = vmax.f32 %v3741_v51, 0.0 }
 0x16a   :  { %v704_v56 = vmax.f32 %v698_v55, 0.0  ;;  %v668_v57 = vpop.f32.mrb[2].mxu0  ;;  %v1002_v55 = vld [vmem:[%s4182_s6] sm:$0xff] }
 0x16b   :  { %v699_v60 = vadd.f32 %v690_v48, %v668_v57  ;;  %v670_v61 = vpop.f32.mrb[3].mxu0  ;;  %v1093_v57 = vld [vmem:[%s4183_s7 + $0x8] sm:$0xff] }
 0x16c   :  { %v700_v2 = vadd.f32 %v694_v49, %v670_v61  ;;  %2445 = vmatprep.mubr.msk.f32.mxu1 %vm727_vm4, %v704_v56  ;;  %v2458_v61 = vld [vmem:[%s4183_s7 + $0x60] sm:$0xff] }
 0x16d   :  { %802 = vmatmul.mubr.f32.vlgmr.msra.gmra.mrb[0].mxu1 %v703_v59  ;;  %v705_v6 = vmax.f32 %v699_v60, 0.0  ;;  %v2457_v60 = vld [vmem:[%s4183_s7 + $0x58] sm:$0xff] }
 0x16e   :  { %v706_v3 = vmax.f32 %v700_v2, 0.0  ;;  %3035 = vmatpush1.bf16.msra.mxu1 %v3034_v58  ;;  %v674_v4 = vpop.f32.mrb[4].mxu0  ;;  %v1003_v58 = vld [vmem:[%s4182_s6 + $0x8] sm:$0xf]  ;;  %v3072_v63 = vpack.c.bf16 %v2458_v61, %v2457_v60  ;;  %v1095_v2 = vld [vmem:[%s4183_s7 + $0x18] sm:$0xff]  ;;  %v2490_v61 = vld [vmem:[%s4183_s7 + $0x140] sm:$0xff] }
 0x16f   :  { %v701_v7 = vadd.f32 %v690_v48, %v674_v4  ;;  %v676_v8 = vpop.f32.mrb[5].mxu0  ;;  %3036 = vmatprep.subr.bf16.mxu1 %v3406_v1  ;;  %v2459_v4 = vld [vmem:[%s4183_s7 + $0x68] sm:$0xff] }
 0x170   :  { %v702_v12 = vadd.f32 %v694_v49, %v676_v8  ;;  %2446 = vmatprep.mubr.msk.f32.mxu1 %vm727_vm4, %v706_v3  ;;  %v1097_v8 = vld [vmem:[%s4183_s7 + $0x28] sm:$0xff] }
 0x171   :  { %807 = vmatmul.mubr.f32.gmra.mrb[2].mxu1 %v705_v6  ;;  %v707_v15 = vmax.f32 %v701_v7, 0.0 }
 0x172   :  { %v708_v13 = vmax.f32 %v702_v12, 0.0  ;;  %3038 = vmatpush1.bf16.msra.mxu1 %v3037_v5  ;;  %v2460_v5 = vld [vmem:[%s4183_s7 + $0x70] sm:$0xff]  ;;  %v2462_v12 = vld [vmem:[%s4183_s7 + $0x80] sm:$0xff] }
 0x173   :  { %3039 = vmatprep.subr.bf16.mxu1 %v3406_v1  ;;  %v3075_v7 = vpack.c.bf16 %v2460_v5, %v2459_v4  ;;  %v2494_v5 = vld [vmem:[%s4183_s7 + $0x160] sm:$0xff] }
 0x174   :  { %2447 = vmatprep.mubr.msk.f32.mxu1 %vm727_vm4, %v708_v13 }
 0x175   :  { %812 = vmatmul.mubr.f32.gmra.mrb[4].mxu1 %v707_v15 }
 0x176   :  { %3041 = vmatpush1.bf16.msra.mxu1 %v3040_v14  ;;  %2448 = vmatprep.mubr.msk.f32.mxu1 %vm727_vm4, %v704_v56  ;;  %v1092_v56 = vld [vmem:[%s4183_s7] sm:$0xff]  ;;  %v3078_v14 = vpack.c.bf16 %v2462_v12, %v2461_v10  ;;  %v1609_v12 = vld [vmem:[%s4186_s10 + $0x8] sm:$0xff] }
 0x177   :  { %3042 = vmatprep.subr.bf16.mxu1 %v3406_v1 }
 0x17a   :  { %3044 = vmatpush1.bf16.msra.mxu1 %v3043_v18  ;;  %v1100_v18 = vld [vmem:[%s4183_s7 + $0x40] sm:$0xff] }
 0x17b   :  { %3045 = vmatprep.subr.bf16.mxu1 %v3406_v1 }
 0x17e   :  { %3047 = vmatpush1.bf16.msra.mxu1 %v3046_v21 }
 0x17f   :  { %3048 = vmatprep.subr.bf16.mxu1 %v3406_v1 }
 0x182   :  { %3050 = vmatpush1.bf16.msra.mxu1 %v3049_v24 }
 0x183   :  { %3051 = vmatprep.subr.bf16.mxu1 %v3406_v1 }
 0x186   :  { %3053 = vmatpush1.bf16.msra.mxu1 %v3052_v27  ;;  %v2476_v27 = vld [vmem:[%s4183_s7 + $0xd8] sm:$0xff] }
 0x187   :  { %3054 = vmatprep.subr.bf16.mxu1 %v3406_v1 }
 0x18a   :  { %3056 = vmatpush1.bf16.msra.mxu1 %v3055_v30  ;;  %v3105_v30 = vpack.c.bf16 %v2477_v28, %v2476_v27  ;;  %v1529_v27 = vld [vmem:[%s4185_s9 + $0x38] sm:$0xff]  ;;  %v1614_v28 = vld [vmem:[%s4186_s10 + $0x30] sm:$0xff] }
 0x18b   :  { %3057 = vmatprep.subr.bf16.mxu1 %v3406_v1 }
 0x18e   :  { %3059 = vmatpush1.bf16.msra.mxu1 %v3058_v33  ;;  %v2478_v33 = vld [vmem:[%s4183_s7 + $0xe8] sm:$0xff] }
 0x18f   :  { %3068 = vmatprep.subr.bf16.mxu1 %v3406_v1 }
 0x191   :  { %900 = vmatmul.mubr.f32.vlgmr.msra.gmra.mrb[6].mxu1 %v703_v59  ;;  %v3081_v59 = vpack.c.bf16 %v1093_v57, %v1092_v56  ;;  %v2488_v56 = vld [vmem:[%s4183_s7 + $0x130] sm:$0xff] }
 0x192   :  { %2449 = vmatprep.mubr.msk.f32.mxu1 %vm727_vm4, %v706_v3  ;;  %3070 = vmatpush3.bf16.msra.mxu1 %v3069_v37  ;;  %v3084_v3 = vpack.c.bf16 %v1095_v2, %v1094_v62  ;;  %v3096_v37 = vpack.c.bf16 %v2469_v32, %v2468_v31  ;;  %v2491_v62 = vld [vmem:[%s4183_s7 + $0x148] sm:$0xff]  ;;  %v2492_v2 = vld [vmem:[%s4183_s7 + $0x150] sm:$0xff]  ;;  %v1530_v31 = vld [vmem:[%s4185_s9 + $0x40] sm:$0xff] }
 0x193   :  { %3071 = vmatprep.subr.bf16.mxu1 %v3406_v1  ;;  %v1531_v32 = vld [vmem:[%s4185_s9 + $0x48] sm:$0xff] }
 0x195   :  { %905 = vmatmul.mubr.f32.gmra.mrb[8].mxu1 %v705_v6  ;;  %v1096_v6 = vld [vmem:[%s4183_s7 + $0x20] sm:$0xff] }
 0x196   :  { %2450 = vmatprep.mubr.msk.f32.mxu1 %vm727_vm4, %v708_v13  ;;  %3073 = vmatpush3.bf16.msra.mxu1 %v3072_v63  ;;  %v3087_v9 = vpack.c.bf16 %v1097_v8, %v1096_v6  ;;  %v1098_v13 = vld [vmem:[%s4183_s7 + $0x30] sm:$0xff]  ;;  %v3123_v63 = vpack.c.bf16 %v2491_v62, %v2490_v61  ;;  %v1523_v8 = vld [vmem:[%s4185_s9 + $0x8] sm:$0xff]  ;;  %vm2325_vm4 = vcmask 31744  }
 0x197   :  { %3074 = vmatprep.subr.bf16.mxu1 %v3406_v1 }
 0x199   :  { %910 = vmatmul.mubr.f32.gmra.mrb[10].mxu1 %v707_v15  ;;  %v1099_v15 = vld [vmem:[%s4183_s7 + $0x38] sm:$0xff] }
 0x19a   :  { %3076 = vmatpush3.bf16.msra.mxu1 %v3075_v7  ;;  %v3090_v16 = vpack.c.bf16 %v1099_v15, %v1098_v13  ;;  %2689 = vmatprep.mubr.msk.f32.mxu1 %vm3408_vm6, %v3405_v0  ;;  %v1522_v7 = vld [vmem:[%s4185_s9] sm:$0xff]  ;;  %v1524_v13 = vld [vmem:[%s4185_s9 + $0x10] sm:$0xff] }
 0x19b   :  { %3077 = vmatprep.subr.bf16.mxu1 %v3406_v1  ;;  %v3129_v10 = vpack.c.bf16 %v1523_v8, %v1522_v7 }
 0x19e   :  { %3079 = vmatpush3.bf16.msra.mxu1 %v3078_v14  ;;  %v1525_v14 = vld [vmem:[%s4185_s9 + $0x18] sm:$0xff] }
 0x19f   :  { %2687 = vmatprep.subr.mxu1 %v3405_v0 }
 0x1a2   :  { %2688 = vmatpush3.msra.mxu1 %v2463_v17  ;;  %v1611_v17 = vld [vmem:[%s4186_s10 + $0x18] sm:$0xff] }
 0x1a3   :  { %3092 = vmatprep.subr.bf16.mxu1 %v3406_v1 }
 0x240   :  { %v803_v38 = vpop.f32.mrb[0].mxu1 }
 0x241   :  { %v805_v39 = vpop.f32.mrb[1].mxu1 }
 0x242   :  { %v2470_v39 = vld [vmem:[%s4183_s7 + $0xb0] sm:$0xff] }
 0x244   :  { %v808_v11 = vpop.f32.mrb[2].mxu1 }
 0x245   :  { %v810_v40 = vpop.f32.mrb[3].mxu1 }
 0x246   :  { %v2480_v40 = vld [vmem:[%s4183_s7 + $0xf8] sm:$0xff] }
 0x248   :  { %v813_v41 = vpop.f32.mrb[4].mxu1 }
 0x249   :  { %v815_v42 = vpop.f32.mrb[5].mxu1 }
 0x264   :  { %v901_v44 = vpop.f32.mrb[6].mxu1 }
 0x265   :  { %v915_v45 = vmax.f32 %v803_v38, %v901_v44  ;;  %v903_v46 = vpop.f32.mrb[7].mxu1  ;;  %v3108_v38 = vpack.c.bf16 %v2479_v34, %v2478_v33  ;;  %v1616_v34 = vld [vmem:[%s4186_s10 + $0x40] sm:$0xff] }
 0x266   :  { %v2473_v46 = vld [vmem:[%s4183_s7 + $0xc8] sm:$0xff] }
 0x268   :  { %v906_v47 = vpop.f32.mrb[8].mxu1 }
 0x269   :  { %v916_v48 = vmax.f32 %v808_v11, %v906_v47  ;;  %v908_v49 = vpop.f32.mrb[9].mxu1  ;;  %v2471_v11 = vld [vmem:[%s4183_s7 + $0xb8] sm:$0xff]  ;;  %v2482_v47 = vld [vmem:[%s4183_s7 + $0x108] sm:$0xff] }
 0x26a   :  { %v3099_v42 = vpack.c.bf16 %v2471_v11, %v2470_v39  ;;  %v1533_v39 = vld [vmem:[%s4185_s9 + $0x58] sm:$0xff]  ;;  %v1618_v11 = vld [vmem:[%s4186_s10 + $0x50] sm:$0xff] }
 0x26b   :  { %v3060_v50 = vpack.c.bf16 %v916_v48, %v915_v45  ;;  %v2472_v45 = vld [vmem:[%s4183_s7 + $0xc0] sm:$0xff]  ;;  %v2483_v48 = vld [vmem:[%s4183_s7 + $0x110] sm:$0xff] }
 0x26c   :  { %v911_v51 = vpop.f32.mrb[10].mxu1  ;;  %v3102_v49 = vpack.c.bf16 %v2473_v46, %v2472_v45  ;;  %v1535_v45 = vld [vmem:[%s4185_s9 + $0x68] sm:$0xff]  ;;  %v1620_v46 = vld [vmem:[%s4186_s10 + $0x60] sm:$0xff] }
 0x26d   :  { %v917_v52 = vmax.f32 %v813_v41, %v911_v51  ;;  %v913_v53 = vpop.f32.mrb[11].mxu1  ;;  %3061 = vmatprep.subr.bf16.mxu0 %v3060_v50  ;;  %v2481_v41 = vld [vmem:[%s4183_s7 + $0x100] sm:$0xff] }
 0x26e   :  { %3063 = vmatpush3.bf16.msra.mxu0 %v3060_v50  ;;  %v3111_v44 = vpack.c.bf16 %v2481_v41, %v2480_v40  ;;  %v2486_v51 = vld [vmem:[%s4183_s7 + $0x120] sm:$0xff]  ;;  %v2474_v53 = vld [vmem:[%s4183_s7 + $0xd0] sm:$0xff]  ;;  %v1619_v40 = vld [vmem:[%s4186_s10 + $0x58] sm:$0xff] }
 0x26f   :  { %2657 = vmatprep.subr.mxu0 %v917_v52 }
 0x272   :  { %2658 = vmatpush3.msra.mxu0 %v917_v52 }
 0x273   :  { %3065 = vmatprep.subr.bf16.mxu0 %v3060_v50  ;;  %2660 = vmatmul.mubr.msk.f32.vlgmr.msra.gmra.mrb[6].mxu0 %vm920_vm5, %v919_v54  ;;  %v2484_v54 = vld [vmem:[%s4183_s7 + $0x118] sm:$0xff] }
 0x274   :  { %3067 = vmatpush3.bf16.msra.mxu0 %v3060_v50  ;;  %2668 = vmatprep.mubr.msk.f32.mxu0 %vm920_vm5, %v1002_v55  ;;  %v3114_v50 = vpack.c.bf16 %v2483_v48, %v2482_v47  ;;  %v1621_v48 = vld [vmem:[%s4186_s10 + $0x68] sm:$0xff] }
 0x275   :  { %2666 = vmatprep.subr.mxu0 %v917_v52 }
 0x278   :  { %2667 = vmatpush3.msra.mxu0 %v917_v52  ;;  %v2487_v52 = vld [vmem:[%s4183_s7 + $0x128] sm:$0xff] }
 0x279   :  { %2669 = vmatmul.mubr.msk.f32.vlgmr.msra.gmra.mrb[8].mxu0 %vm920_vm5, %v1003_v58  ;;  %3080 = vmatprep.subr.bf16.mxu0 %v3406_v1  ;;  %v3117_v55 = vpack.c.bf16 %v2487_v52, %v2486_v51  ;;  %v1537_v51 = vld [vmem:[%s4185_s9 + $0x78] sm:$0xff] }
 0x27a   :  { %3082 = vmatpush3.bf16.msra.mxu0 %v3081_v59  ;;  %2710 = vmatprep.mubr.msk.f32.mxu0 %vm3408_vm6, %v3405_v0  ;;  %v2489_v59 = vld [vmem:[%s4183_s7 + $0x138] sm:$0xff] }
 0x27b   :  { %3083 = vmatprep.subr.bf16.mxu0 %v3406_v1  ;;  %v3120_v60 = vpack.c.bf16 %v2489_v59, %v2488_v56 }
 0x27e   :  { %3085 = vmatpush3.bf16.msra.mxu0 %v3084_v3  ;;  %v2493_v3 = vld [vmem:[%s4183_s7 + $0x158] sm:$0xff] }
 0x27f   :  { %3086 = vmatprep.subr.bf16.mxu0 %v3406_v1  ;;  %v3126_v4 = vpack.c.bf16 %v2493_v3, %v2492_v2 }
 0x282   :  { %3088 = vmatpush3.bf16.msra.mxu0 %v3087_v9  ;;  %v1608_v9 = vld [vmem:[%s4186_s10] sm:$0xff] }
 0x283   :  { %3089 = vmatprep.subr.bf16.mxu0 %v3406_v1  ;;  %v3153_v15 = vpack.c.bf16 %v1609_v12, %v1608_v9  ;;  %v1848_v12 = vld [vmem:[#allocation10] sm:$0xff] }
 0x286   :  { %3091 = vmatpush3.bf16.msra.mxu0 %v3090_v16  ;;  %v1610_v16 = vld [vmem:[%s4186_s10 + $0x10] sm:$0xff] }
 0x287   :  { %2708 = vmatprep.subr.mxu0 %v3405_v0 }
 0x28a   :  { %2709 = vmatpush3.msra.mxu0 %v1100_v18  ;;  %v3132_v18 = vpack.c.bf16 %v1525_v14, %v1524_v13  ;;  %v1849_v13 = vld [vmem:[#allocation10 + $0x8] sm:$0xff] }
 0x28b   :  { %3104 = vmatprep.subr.bf16.mxu0 %v3406_v1  ;;  %v3189_v14 = vpack.c.bf16 %v1849_v13, %v1848_v12 }
 0x346   :  { %v2661_v19 = vpop.f32.mrb[6].mxu0 }
 0x347   :  { %v993_v20 = vpop.f32.mrb[7].mxu0 }
 0x34c   :  { %v2670_v21 = vpop.f32.mrb[8].mxu0 }
 0x34d   :  { %v1086_v22 = vmax.f32 %v2661_v19, %v2670_v21  ;;  %v1076_v23 = vpop.f32.mrb[9].mxu0  ;;  %v3156_v19 = vpack.c.bf16 %v1611_v17, %v1610_v16  ;;  %v1527_v21 = vld [vmem:[%s4185_s9 + $0x28] sm:$0xff] }
 0x34e   :  { %v1085_v24 = vmax.f32 %v993_v20, %v1076_v23  ;;  %v1526_v20 = vld [vmem:[%s4185_s9 + $0x20] sm:$0xff] }
 0x34f   :  { %1090 = vst.msk [vmem:[#allocation2 + $0x8] sm:$0xf] %vm1089_vm7, %v1086_v22  ;;  %v1612_v22 = vld [vmem:[%s4186_s10 + $0x20] sm:$0xff]  ;;  %v3135_v23 = vpack.c.bf16 %v1527_v21, %v1526_v20 }
 0x350   :  { %1088 = vst.msk [vmem:[#allocation2] sm:$0xff] %vm1087_vm8, %v1085_v24  ;;  %v1613_v24 = vld [vmem:[%s4186_s10 + $0x28] sm:$0xff]  ;;  %v1695_v20 = vld [vmem:[%s4187_s11] sm:$0xf] }
 0x351   :  { %v3159_v25 = vpack.c.bf16 %v1613_v24, %v1612_v22  ;;  %v1858_v21 = vld [vmem:[#allocation10 + $0x40] sm:$0xff]  ;;  %v1859_v22 = vld [vmem:[#allocation10 + $0x48] sm:$0xff] }
 0x352   :  { %v3177_v24 = vpack.c.bf16 %v1859_v22, %v1858_v21  ;;  %v2188_v21 = vld [vmem:[%s4191_s15 + $0x20] sm:$0xff]  ;;  %v2189_v22 = vld [vmem:[%s4191_s15 + $0x28] sm:$0xff] }
 0x357   :  { %v1101_v35 = vld [vmem:[#allocation2 + $0x1] sm:$0xff] }
 0x358   :  { %v1091_v36 = vld [vmem:[#allocation2] sm:$0xff]  ;;  %2690 = vmatmul.mubr.msk.f32.vlgmr.msra.gmra.mrb[12].mxu1 %vm1087_vm8, %v1101_v35  ;;  %v1617_v35 = vld [vmem:[%s4186_s10 + $0x48] sm:$0xff] }
 0x359   :  { %2711 = vmatmul.mubr.msk.f32.vlgmr.msra.gmra.mrb[10].mxu0 %vm1087_vm8, %v1091_v36  ;;  %3094 = vmatpush3.bf16.msra.mxu1 %v3093_v29  ;;  %v1258_v57 = vld [vmem:[#allocation2 + $0x2] sm:$0xff]  ;;  %v3138_v29 = vpack.c.bf16 %v1529_v27, %v1528_v26  ;;  %v3141_v36 = vpack.c.bf16 %v1531_v32, %v1530_v31  ;;  %v1850_v27 = vld [vmem:[#allocation10 + $0x10] sm:$0xff]  ;;  %v1863_v32 = vld [vmem:[#allocation10 + $0x68] sm:$0xff] }
 0x35a   :  { %3106 = vmatpush3.bf16.msra.mxu0 %v3105_v30  ;;  %3095 = vmatprep.subr.bf16.mxu1 %v3406_v1  ;;  %v1343_v58 = vld [vmem:[#allocation2 + $0x3] sm:$0xff]  ;;  %v1615_v30 = vld [vmem:[%s4186_s10 + $0x38] sm:$0xff] }
 0x35b   :  { %3107 = vmatprep.subr.bf16.mxu0 %v3406_v1  ;;  %2731 = vmatprep.mubr.msk.f32.mxu1 %vm3408_vm6, %v3405_v0  ;;  %v1428_v6 = vld [vmem:[#allocation2 + $0x4] sm:$0xff]  ;;  %v3162_v33 = vpack.c.bf16 %v1615_v30, %v1614_v28 }
 0x35c   :  { %2752 = vmatprep.mubr.msk.f32.mxu0 %vm3408_vm6, %v3405_v0  ;;  %v1861_v26 = vld [vmem:[#allocation10 + $0x58] sm:$0xff]  ;;  %v1862_v31 = vld [vmem:[#allocation10 + $0x60] sm:$0xff] }
 0x35d   :  { %3097 = vmatpush3.bf16.msra.mxu1 %v3096_v37  ;;  %v3165_v37 = vpack.c.bf16 %v1617_v35, %v1616_v34  ;;  %v3183_v34 = vpack.c.bf16 %v1863_v32, %v1862_v31  ;;  %v1853_v35 = vld [vmem:[#allocation10 + $0x28] sm:$0xff] }
 0x35e   :  { %3109 = vmatpush3.bf16.msra.mxu0 %v3108_v38  ;;  %3098 = vmatprep.subr.bf16.mxu1 %v3406_v1  ;;  %v1532_v38 = vld [vmem:[%s4185_s9 + $0x50] sm:$0xff] }
 0x35f   :  { %3110 = vmatprep.subr.bf16.mxu0 %v3406_v1  ;;  %v3144_v41 = vpack.c.bf16 %v1533_v39, %v1532_v38  ;;  %v1865_v38 = vld [vmem:[#allocation10 + $0x78] sm:$0xff]  ;;  %v1854_v39 = vld [vmem:[#allocation10 + $0x30] sm:$0xff] }
 0x361   :  { %3100 = vmatpush3.bf16.msra.mxu1 %v3099_v42  ;;  %v3168_v42 = vpack.c.bf16 %v1619_v40, %v1618_v11  ;;  %v1855_v40 = vld [vmem:[#allocation10 + $0x38] sm:$0xff] }
 0x362   :  { %3112 = vmatpush3.bf16.msra.mxu0 %v3111_v44  ;;  %3101 = vmatprep.subr.bf16.mxu1 %v3406_v1  ;;  %v1534_v44 = vld [vmem:[%s4185_s9 + $0x60] sm:$0xff] }
 0x363   :  { %3113 = vmatprep.subr.bf16.mxu0 %v3406_v1  ;;  %v3147_v47 = vpack.c.bf16 %v1535_v45, %v1534_v44 }
 0x365   :  { %3103 = vmatpush3.bf16.msra.mxu1 %v3102_v49  ;;  %v3171_v49 = vpack.c.bf16 %v1621_v48, %v1620_v46  ;;  %v2015_v48 = vld [vmem:[#allocation10 + $0x80] sm:$0xff] }
 0x366   :  { %3115 = vmatpush3.bf16.msra.mxu0 %v3114_v50  ;;  %2729 = vmatprep.subr.mxu1 %v3405_v0  ;;  %v1536_v50 = vld [vmem:[%s4185_s9 + $0x70] sm:$0xff] }
 0x367   :  { %2750 = vmatprep.subr.mxu0 %v3405_v0  ;;  %v3150_v52 = vpack.c.bf16 %v1537_v51, %v1536_v50  ;;  %v2099_v50 = vld [vmem:[#allocation10 + $0xc0] sm:$0xff]  ;;  %v2100_v51 = vld [vmem:[#allocation10 + $0xc8] sm:$0xff] }
 0x369   :  { %2730 = vmatpush3.msra.mxu1 %v2474_v53  ;;  %v1622_v53 = vld [vmem:[%s4186_s10 + $0x70] sm:$0xff] }
 0x36a   :  { %2751 = vmatpush3.msra.mxu0 %v2484_v54  ;;  %2732 = vmatmul.mubr.msk.f32.vlgmr.msra.gmra.mrb[14].mxu1 %vm1087_vm8, %v1258_v57  ;;  %v1623_v54 = vld [vmem:[%s4186_s10 + $0x78] sm:$0xff] }
 0x36b   :  { %2753 = vmatmul.mubr.msk.f32.vlgmr.msra.gmra.mrb[12].mxu0 %vm1087_vm8, %v1343_v58  ;;  %3116 = vmatprep.subr.bf16.mxu1 %v3406_v1 }
 0x36c   :  { %2773 = vmatprep.mubr.msk.f32.mxu1 %vm3408_vm6, %v3405_v0  ;;  %3118 = vmatpush3.bf16.msra.mxu1 %v3117_v55  ;;  %v3174_v55 = vpack.c.bf16 %v1623_v54, %v1622_v53  ;;  %v3213_v53 = vpack.c.bf16 %v2100_v51, %v2099_v50  ;;  %v2017_v54 = vld [vmem:[#allocation10 + $0x90] sm:$0xff] }
 0x36d   :  { %3128 = vmatprep.subr.bf16.mxu0 %v3406_v1  ;;  %3119 = vmatprep.subr.bf16.mxu1 %v3406_v1 }
 0x36e   :  { %2808 = vmatprep.mubr.msk.f32.mxu0 %vm3408_vm6, %v3405_v0  ;;  %3130 = vmatpush3.bf16.msra.mxu0 %v3129_v10 }
 0x36f   :  { %3131 = vmatprep.subr.bf16.mxu0 %v3406_v1 }
 0x370   :  { %3121 = vmatpush3.bf16.msra.mxu1 %v3120_v60 }
 0x371   :  { %3122 = vmatprep.subr.bf16.mxu1 %v3406_v1 }
 0x372   :  { %3133 = vmatpush3.bf16.msra.mxu0 %v3132_v18 }
 0x373   :  { %3134 = vmatprep.subr.bf16.mxu0 %v3406_v1 }
 0x374   :  { %3124 = vmatpush3.bf16.msra.mxu1 %v3123_v63 }
 0x375   :  { %3125 = vmatprep.subr.bf16.mxu1 %v3406_v1 }
 0x376   :  { %3136 = vmatpush3.bf16.msra.mxu0 %v3135_v23  ;;  %v1770_v23 = vld [vmem:[%s4188_s12] sm:$0xf] }
 0x377   :  { %3137 = vmatprep.subr.bf16.mxu0 %v3406_v1 }
 0x378   :  { %3127 = vmatpush3.bf16.msra.mxu1 %v3126_v4 }
 0x379   :  { %2771 = vmatprep.subr.mxu1 %v3405_v0 }
 0x37a   :  { %3139 = vmatpush3.bf16.msra.mxu0 %v3138_v29  ;;  %v1851_v29 = vld [vmem:[#allocation10 + $0x18] sm:$0xff] }
 0x37b   :  { %3140 = vmatprep.subr.bf16.mxu0 %v3406_v1  ;;  %v3192_v30 = vpack.c.bf16 %v1851_v29, %v1850_v27 }
 0x37c   :  { %2772 = vmatpush3.msra.mxu1 %v2494_v5 }
 0x37d   :  { %2774 = vmatmul.mubr.msk.f32.vlgmr.msra.gmra.mrb[16].mxu1 %vm1087_vm8, %v1428_v6  ;;  %3152 = vmatprep.subr.bf16.mxu1 %v3406_v1  ;;  %v2496_v6 = vld [vmem:[#allocation9] ss:$0 sm:$0xff] }
 0x37e   :  { %2843 = vmatprep.mubr.msk.f32.mxu1 %vm3408_vm6, %v3405_v0  ;;  %3154 = vmatpush3.bf16.msra.mxu1 %v3153_v15 }
 0x37f   :  { %3155 = vmatprep.subr.bf16.mxu1 %v3406_v1  ;;  %3142 = vmatpush3.bf16.msra.mxu0 %v3141_v36 }
 0x380   :  { %3143 = vmatprep.subr.bf16.mxu0 %v3406_v1 }
 0x382   :  { %3157 = vmatpush3.bf16.msra.mxu1 %v3156_v19 }
 0x383   :  { %3158 = vmatprep.subr.bf16.mxu1 %v3406_v1  ;;  %3145 = vmatpush3.bf16.msra.mxu0 %v3144_v41  ;;  %v3198_v41 = vpack.c.bf16 %v1855_v40, %v1854_v39  ;;  %v2192_v40 = vld [vmem:[%s4192_s16] sm:$0x1] }
 0x384   :  { %3146 = vmatprep.subr.bf16.mxu0 %v3406_v1 }
 0x386   :  { %3160 = vmatpush3.bf16.msra.mxu1 %v3159_v25  ;;  %v1860_v25 = vld [vmem:[#allocation10 + $0x50] sm:$0xff] }
 0x387   :  { %3161 = vmatprep.subr.bf16.mxu1 %v3406_v1  ;;  %3148 = vmatpush3.bf16.msra.mxu0 %v3147_v47  ;;  %v3180_v28 = vpack.c.bf16 %v1861_v26, %v1860_v25  ;;  %v2191_v25 = vld [vmem:[%s4191_s15 + $0x38] sm:$0xff] }
 0x388   :  { %3149 = vmatprep.subr.bf16.mxu0 %v3406_v1 }
 0x38a   :  { %3163 = vmatpush3.bf16.msra.mxu1 %v3162_v33  ;;  %v1852_v33 = vld [vmem:[#allocation10 + $0x20] sm:$0xff] }
 0x38b   :  { %3164 = vmatprep.subr.bf16.mxu1 %v3406_v1  ;;  %3151 = vmatpush3.bf16.msra.mxu0 %v3150_v52  ;;  %v3195_v36 = vpack.c.bf16 %v1853_v35, %v1852_v33 }
 0x38c   :  { %2846 = vmatprep.subr.mxu0 %v3405_v0 }
 0x38e   :  { %3166 = vmatpush3.bf16.msra.mxu1 %v3165_v37  ;;  %v1864_v37 = vld [vmem:[#allocation10 + $0x70] sm:$0xff] }
 0x38f   :  { %3167 = vmatprep.subr.bf16.mxu1 %v3406_v1  ;;  %v3186_v11 = vpack.c.bf16 %v1865_v38, %v1864_v37 }
 0x392   :  { %3169 = vmatpush3.bf16.msra.mxu1 %v3168_v42 }
 0x393   :  { %3170 = vmatprep.subr.bf16.mxu1 %v3406_v1 }
 0x396   :  { %3172 = vmatpush3.bf16.msra.mxu1 %v3171_v49  ;;  %v2016_v49 = vld [vmem:[#allocation10 + $0x88] sm:$0xff] }
 0x397   :  { %3173 = vmatprep.subr.bf16.mxu1 %v3406_v1  ;;  %v3201_v52 = vpack.c.bf16 %v2016_v49, %v2015_v48 }
 0x39a   :  { %3175 = vmatpush3.bf16.msra.mxu1 %v3174_v55  ;;  %v2018_v55 = vld [vmem:[#allocation10 + $0x98] sm:$0xff] }
 0x39b   :  { %3188 = vmatprep.subr.bf16.mxu1 %v3406_v1 }
 0x42b   :  { %v1181_v56 = vpop.f32.mrb[12].mxu1 }
 0x42c   :  { %v1254_v57 = vpop.f32.mrb[10].mxu0  ;;  %v2691_v59 = vpop.f32.mrb[13].mxu1 }
 0x42d   :  { %v1255_v58 = vadd.f32 %v1254_v57, %v1181_v56  ;;  %v2712_v60 = vpop.f32.mrb[11].mxu0  ;;  %v2101_v56 = vld [vmem:[#allocation10 + $0xd0] sm:$0xff]  ;;  %v2102_v57 = vld [vmem:[#allocation10 + $0xd8] sm:$0xff] }
 0x42e   :  { %v3204_v60 = vpack.c.bf16 %v2018_v55, %v2017_v54 }
 0x43d   :  { %v1338_v61 = vpop.f32.mrb[14].mxu1 }
 0x43e   :  { %v1423_v62 = vpop.f32.mrb[12].mxu0  ;;  %v1342_v63 = vadd.f32 %v1338_v61, %v1255_v58  ;;  %v2733_v2 = vpop.f32.mrb[15].mxu1  ;;  %v3216_v61 = vpack.c.bf16 %v2102_v57, %v2101_v56 }
 0x43f   :  { %v2754_v3 = vpop.f32.mrb[13].mxu0  ;;  %v2103_v2 = vld [vmem:[#allocation10 + $0xe0] sm:$0xff] }
 0x440   :  { %v1427_v4 = vadd.f32 %v1423_v62, %v1342_v63  ;;  %v2019_v62 = vld [vmem:[#allocation10 + $0xa0] sm:$0xff]  ;;  %v2020_v63 = vld [vmem:[#allocation10 + $0xa8] sm:$0xff] }
 0x441   :  { %v2104_v3 = vld [vmem:[#allocation10 + $0xe8] sm:$0xff] }
 0x450   :  { %v1508_v5 = vpop.f32.mrb[16].mxu1 }
 0x451   :  { %v1512_v7 = vadd.f32 %v1508_v5, %v1427_v4  ;;  %v2775_v8 = vpop.f32.mrb[17].mxu1  ;;  %v3207_v4 = vpack.c.bf16 %v2020_v63, %v2019_v62  ;;  %v3219_v5 = vpack.c.bf16 %v2104_v3, %v2103_v2 }
 0x452   :  { %v2105_v8 = vld [vmem:[#allocation10 + $0xf0] sm:$0xff] }
 0x453   :  { %v1520_v9 = vadd.f32 %v2496_v6, %v1512_v7  ;;  %v2021_v6 = vld [vmem:[#allocation10 + $0xb0] sm:$0xff]  ;;  %v2022_v7 = vld [vmem:[#allocation10 + $0xb8] sm:$0xff] }
 0x455   :  { %v1521_v10 = vmax.f32 %v1520_v9, 0.0  ;;  %v2106_v9 = vld [vmem:[#allocation10 + $0xf8] sm:$0xff] }
 0x456   :  { %v3222_v12 = vpack.c.bf16 %v2106_v9, %v2105_v8 }
 0x457   :  { %2809 = vmatmul.mubr.f32.vlgmr.msra.gmra.mrb[14].mxu0 %v1521_v10  ;;  %2844 = vmatmul.mubr.f32.vlgmr.msra.gmra.mrb[18].mxu1 %v1521_v10  ;;  %v3210_v10 = vpack.c.bf16 %v2022_v7, %v2021_v6 }
 0x458   :  { %2848 = vmatprep.mubr.msk.f32.mxu0 %vm3408_vm6, %v3405_v0  ;;  %2891 = vmatprep.mubr.msk.f32.mxu1 %vm3408_vm6, %v3405_v0 }
 0x459   :  { %3190 = vmatpush3.bf16.msra.mxu1 %v3189_v14 }
 0x45a   :  { %3191 = vmatprep.subr.bf16.mxu1 %v3406_v1 }
 0x45d   :  { %3193 = vmatpush3.bf16.msra.mxu1 %v3192_v30 }
 0x45e   :  { %3194 = vmatprep.subr.bf16.mxu1 %v3406_v1 }
 0x461   :  { %3196 = vmatpush3.bf16.msra.mxu1 %v3195_v36  ;;  %v2181_v36 = vld [vmem:[%s4190_s14] sm:$0x1] }
 0x462   :  { %3197 = vmatprep.subr.bf16.mxu1 %v3406_v1 }
 0x465   :  { %3199 = vmatpush3.bf16.msra.mxu1 %v3198_v41 }
 0x466   :  { %3212 = vmatprep.subr.bf16.mxu1 %v3406_v1 }
 0x52a   :  { %v1604_v15 = vpop.f32.mrb[14].mxu0  ;;  %v1690_v16 = vpop.f32.mrb[18].mxu1 }
 0x52b   :  { %v1694_v17 = vmax.f32 %v1604_v15, %v1690_v16  ;;  %v2810_v18 = vpop.f32.mrb[15].mxu0  ;;  %v2845_v19 = vpop.f32.mrb[19].mxu1  ;;  %v2184_v15 = vld [vmem:[%s4191_s15] sm:$0xff]  ;;  %v2185_v16 = vld [vmem:[%s4191_s15 + $0x8] sm:$0xff] }
 0x52c   :  { %v3225_v18 = vpack.c.bf16 %v2185_v16, %v2184_v15  ;;  %v2187_v19 = vld [vmem:[%s4191_s15 + $0x18] sm:$0xff] }
 0x52d   :  { %2847 = vmatpush3.msra.mxu0 %v1694_v17 }
 0x52e   :  { %2849 = vmatmul.mubr.msk.f32.vlgmr.msra.gmra.mrb[16].mxu0 %vm1696_vm9, %v1695_v20  ;;  %2851 = vmatprep.subr.mxu0 %v3405_v0 }
 0x52f   :  { %2852 = vmatpush3.msra.mxu0 %v1694_v17  ;;  %2853 = vmatprep.mubr.msk.f32.mxu0 %vm3408_vm6, %v3405_v0  ;;  %v2186_v17 = vld [vmem:[%s4191_s15 + $0x10] sm:$0xff] }
 0x530   :  { %3176 = vmatprep.subr.bf16.mxu0 %v3406_v1  ;;  %v3228_v20 = vpack.c.bf16 %v2187_v19, %v2186_v17 }
 0x532   :  { %2854 = vmatmul.mubr.msk.f32.vlgmr.msra.gmra.mrb[18].mxu0 %vm1696_vm9, %v1770_v23  ;;  %v3231_v23 = vpack.c.bf16 %v2189_v22, %v2188_v21 }
 0x533   :  { %3178 = vmatpush3.bf16.msra.mxu0 %v3177_v24  ;;  %2872 = vmatprep.mubr.msk.f32.mxu0 %vm3408_vm6, %v3405_v0  ;;  %v2190_v24 = vld [vmem:[%s4191_s15 + $0x30] sm:$0xff] }
 0x534   :  { %3179 = vmatprep.subr.bf16.mxu0 %v3406_v1  ;;  %v3234_v26 = vpack.c.bf16 %v2191_v25, %v2190_v24 }
 0x537   :  { %3181 = vmatpush3.bf16.msra.mxu0 %v3180_v28 }
 0x538   :  { %3182 = vmatprep.subr.bf16.mxu0 %v3406_v1 }
 0x53b   :  { %3184 = vmatpush3.bf16.msra.mxu0 %v3183_v34 }
 0x53c   :  { %3185 = vmatprep.subr.bf16.mxu0 %v3406_v1 }
 0x53f   :  { %3187 = vmatpush3.bf16.msra.mxu0 %v3186_v11  ;;  %v2267_v11 = vand.u32 127, %v687_v43 }
 0x540   :  { %3200 = vmatprep.subr.bf16.mxu0 %v3406_v1 }
 0x541   :  { %vm2268_vm12 = vcmp.eq.s32.totalorder %v2267_v11, 0  ;;  %vm2309_vm15 = vcmp.eq.s32.totalorder %v2267_v11, 1  ;;  %vm2317_vm2 = vcmp.eq.s32.totalorder %v2267_v11, 3 }
 0x542   :  { %v2504_v16 = vsel %vm2268_vm12, 1.0, %v3405_v0  ;;  %vm2318_vm3 = vmor %vm2268_vm12, %vm2317_vm2 }
 0x601   :  { %v1766_v42 = vpop.f32.mrb[16].mxu0 }
 0x602   :  { %v2850_v44 = vpop.f32.mrb[17].mxu0 }
 0x605   :  { %v1840_v45 = vpop.f32.mrb[18].mxu0 }
 0x606   :  { %v1844_v46 = vmax.f32 %v1766_v42, %v1840_v45  ;;  %v2855_v47 = vpop.f32.mrb[19].mxu0  ;;  %v3409_v42 = vmov 2.0  }
 0x607   :  { %v2269_v44 = vsel %vm2268_vm12, 1.0, %v3409_v42 }
 0x608   :  { %1846 = vst.msk [vmem:[#allocation3] sm:$0xf] %vm1845_vm10, %v1844_v46 }
 0x60f   :  { %v1856_v58 = vld [vmem:[#allocation3 + $0x1] sm:$0x1]  ;;  %v1847_v59 = vld [vmem:[#allocation3] sm:$0x1]  ;;  %v2013_v13 = vld [vmem:[#allocation3 + $0x2] sm:$0x1] }
 0x610   :  { %2873 = vmatmul.mubr.msk.f32.vlgmr.msra.gmra.mrb[20].mxu0 %vm1866_vm11, %v1856_v58  ;;  %2892 = vmatmul.mubr.msk.f32.vlgmr.msra.gmra.mrb[20].mxu1 %vm1866_vm11, %v1847_v59  ;;  %v2097_v14 = vld [vmem:[#allocation3 + $0x3] sm:$0x1] }
 0x611   :  { %3202 = vmatpush3.bf16.msra.mxu0 %v3201_v52  ;;  %3214 = vmatpush3.bf16.msra.mxu1 %v3213_v53 }
 0x612   :  { %3203 = vmatprep.subr.bf16.mxu0 %v3406_v1  ;;  %3215 = vmatprep.subr.bf16.mxu1 %v3406_v1 }
 0x613   :  { %2910 = vmatprep.mubr.msk.f32.mxu0 %vm3408_vm6, %v3405_v0  ;;  %2929 = vmatprep.mubr.msk.f32.mxu1 %vm3408_vm6, %v3405_v0 }
 0x615   :  { %3205 = vmatpush3.bf16.msra.mxu0 %v3204_v60  ;;  %3217 = vmatpush3.bf16.msra.mxu1 %v3216_v61 }
 0x616   :  { %3206 = vmatprep.subr.bf16.mxu0 %v3406_v1  ;;  %3218 = vmatprep.subr.bf16.mxu1 %v3406_v1 }
 0x619   :  { %3208 = vmatpush3.bf16.msra.mxu0 %v3207_v4  ;;  %3220 = vmatpush3.bf16.msra.mxu1 %v3219_v5 }
 0x61a   :  { %3209 = vmatprep.subr.bf16.mxu0 %v3406_v1  ;;  %3221 = vmatprep.subr.bf16.mxu1 %v3406_v1 }
 0x61d   :  { %3211 = vmatpush3.bf16.msra.mxu0 %v3210_v10  ;;  %3223 = vmatpush3.bf16.msra.mxu1 %v3222_v12 }
 0x61e   :  { %3224 = vmatprep.subr.bf16.mxu0 %v3406_v1  ;;  %2951 = vmatprep.subr.mxu1 %v3405_v0 }
 0x620   :  { %2911 = vmatmul.mubr.msk.f32.vlgmr.msra.gmra.mrb[22].mxu0 %vm1866_vm11, %v2013_v13  ;;  %2930 = vmatmul.mubr.msk.f32.vlgmr.msra.gmra.mrb[22].mxu1 %vm1866_vm11, %v2097_v14 }
 0x621   :  { %2948 = vmatprep.mubr.msk.f32.mxu0 %vm3408_vm6, %v3405_v0  ;;  %2953 = vmatprep.mubr.msk.f32.mxu1 %vm3408_vm6, %v3405_v0 }
 0x622   :  { %3226 = vmatpush3.bf16.msra.mxu0 %v3225_v18  ;;  %v2505_v18 = vsel %vm2309_vm15, 1.0, %v3405_v0 }
 0x623   :  { %3227 = vmatprep.subr.bf16.mxu0 %v3406_v1 }
 0x626   :  { %3229 = vmatpush3.bf16.msra.mxu0 %v3228_v20 }
 0x627   :  { %3230 = vmatprep.subr.bf16.mxu0 %v3406_v1 }
 0x62a   :  { %3232 = vmatpush3.bf16.msra.mxu0 %v3231_v23  ;;  %v2323_v23 = vld [vmem:[%s4193_s17] sm:$0xf]  ;;  %s3411_s17 = smov [#allocation12]  }
 0x62b   :  { %3233 = vmatprep.subr.bf16.mxu0 %v3406_v1  ;;  %2952 = vmatpush3.msk.msra.mxu1 %vm149_vm0, %v2323_v23  ;;  %s2409_s21 = sshll.u32 %s3411_s17, 4  ;;  %s2410_s21 = int_to_ptr.vmem [resolvable:$true] %s2409_s21 }
 0x62c   :  { %s3367_s9 = scalar_lea.vmem %s2410_s21, 16  ;;  %s3371_s10 = scalar_lea.vmem %s2410_s21, 32 }
 0x62d   :  { %p3368_p4 = scmp.ne.s32.totalorder %s2410_s21, %s3367_s9  ;;  %p3372_p5 = scmp.lt.s32.totalorder %s2410_s21, %s2410_s21 }
 0x62e   :  { %3235 = vmatpush3.bf16.msra.mxu0 %v3234_v26  ;;  %v3410_v26 = vmov -1.0   ;;  %p3373_p6 = scmp.lt.s32.totalorder %s3371_s10, %s3367_s9 }
 0x630   :  { %p3374_p7 = por %p3373_p6, %p3372_p5 }
 0x632   :  { %p3375_p8 = pnand %p3374_p7, %p3368_p4 }
 0x6e3   :  { %v1936_v27 = vpop.f32.mrb[20].mxu0  ;;  %v2009_v28 = vpop.f32.mrb[20].mxu1 }
 0x6e4   :  { %v2010_v29 = vadd.f32 %v2009_v28, %v1936_v27  ;;  %v2874_v30 = vpop.f32.mrb[21].mxu0  ;;  %v2893_v31 = vpop.f32.mrb[21].mxu1  ;;  %v2319_v27 = vsel %vm2318_vm3, 1.0, %v3410_v26 }
 0x6e5   :  { %v2324_v31 = vld [vmem:[%s4194_s18] sm:$0x1] }
 0x6f3   :  { %v2092_v32 = vpop.f32.mrb[22].mxu0  ;;  %v2176_v33 = vpop.f32.mrb[22].mxu1 }
 0x6f4   :  { %v2096_v34 = vadd.f32 %v2092_v32, %v2010_v29  ;;  %v2912_v35 = vpop.f32.mrb[23].mxu0  ;;  %v2931_v1 = vpop.f32.mrb[23].mxu1 }
 0x6f6   :  { %v2180_v37 = vadd.f32 %v2176_v33, %v2096_v34 }
 0x6f8   :  { %v2182_v38 = vadd.f32 %v2181_v36, %v2180_v37 }
 0x6fa   :  { %v2183_v39 = vmax.f32 %v2182_v38, 0.0 }
 0x6fc   :  { %2949 = vmatmul.mubr.msk.f32.vlgmr.msra.gmra.mrb[24].mxu0 %vm1866_vm11, %v2183_v39 }
 0x7cf   :  { %v2262_v41 = vpop.f32.mrb[24].mxu0 }
 0x7d0   :  { %v2263_v45 = vadd.f32 %v2262_v41, %v2192_v40  ;;  %v2950_v46 = vpop.f32.mrb[25].mxu0 }
 0x7d2   :  { %v2270_v47 = vmul.f32 %v2269_v44, %v2263_v45 }
 0x7d4   :  { %v2271_v48 = vmul.f32 0.31830987, %v2270_v47 }
 0x7d6   :  { %v2272_v49 = vadd.f32 0.5, %v2271_v48 }
 0x7d8   :  { %v3260_v50 = vtrunc.f32 %v2272_v49 }
 0x7da   :  { %v3261_v51 = vcvt.f32.s32 %v3260_v50 }
 0x7dc   :  { %v2274_v52 = vcvt.s32.f32 %v3261_v51 }
 0x7de   :  { %vm2275_vm13 = vcmp.lt.f32.partialorder %v2272_v49, %v2274_v52 }
 0x7df   :  { %v2276_v43 = vsel %vm2275_vm13, 1.0, %v3405_v0 }
 0x7e0   :  { %v2277_v53 = vsub.f32 %v2274_v52, %v2276_v43 }
 0x7e2   :  { %v2278_v54 = vmul.f32 3.1415927, %v2277_v53  ;;  %v2280_v55 = vmul.f32 0.5, %v2277_v53 }
 0x7e4   :  { %v2279_v56 = vsub.f32 %v2270_v47, %v2278_v54  ;;  %v3262_v57 = vtrunc.f32 %v2280_v55 }
 0x7e6   :  { %v2289_v58 = vmul.f32 %v2279_v56, %v2279_v56  ;;  %v3263_v59 = vcvt.f32.s32 %v3262_v57 }
 0x7e8   :  { %v2282_v60 = vcvt.s32.f32 %v3263_v59  ;;  %v2290_v61 = vmul.f32 -2.5052108e-08, %v2289_v58 }
 0x7ea   :  { %vm2283_vm14 = vcmp.lt.f32.partialorder %v2280_v55, %v2282_v60  ;;  %v2291_v62 = vadd.f32 2.7557319e-06, %v2290_v61 }
 0x7eb   :  { %v2284_v2 = vsel %vm2283_vm14, 1.0, %v3405_v0 }
 0x7ec   :  { %v2292_v63 = vmul.f32 %v2291_v62, %v2289_v58  ;;  %v2285_v4 = vsub.f32 %v2282_v60, %v2284_v2 }
 0x7ee   :  { %v2293_v3 = vadd.f32 -0.0001984127, %v2292_v63  ;;  %v2286_v7 = vsub.f32 %v2280_v55, %v2285_v4 }
 0x7f0   :  { %v2294_v5 = vmul.f32 %v2293_v3, %v2289_v58  ;;  %v2287_v10 = vmul.f32 4.0, %v2286_v7 }
 0x7f2   :  { %v2295_v6 = vadd.f32 0.008333334, %v2294_v5  ;;  %v2288_v14 = vsub.f32 1.0, %v2287_v10 }
 0x7f4   :  { %v2296_v8 = vmul.f32 %v2295_v6, %v2289_v58 }
 0x7f6   :  { %v2297_v9 = vadd.f32 -0.16666667, %v2296_v8 }
 0x7f8   :  { %v2298_v12 = vmul.f32 %v2297_v9, %v2289_v58 }
 0x7fa   :  { %v2299_v13 = vadd.f32 1.0, %v2298_v12 }
 0x7fc   :  { %v2300_v15 = vmul.f32 %v2299_v13, %v2279_v56 }
 0x7fe   :  { %v2301_v17 = vmul.f32 %v2300_v15, %v2288_v14 }
 0x800   :  { %v2304_v19 = vmul.f32 %v2504_v16, %v2301_v17  ;;  %v2312_v21 = vmul.f32 %v2505_v18, %v2301_v17 }
 0x802   :  { %v2306_v20 = vsel %vm2305_vm1, %v2304_v19, 0.0  ;;  %v2313_v22 = vsel %vm2305_vm1, %v2312_v21, 0.0 }
 0x803   :  { %2307 = vadd.xlane.f32.xlu0 %v2306_v20 }
 0x807   :  { %2314 = vadd.xlane.f32.xlu0 %v2313_v22 }
 0x890   :  { %v2308_v24 = vpop.xlane.xlu0 %2307 }
 0x894   :  { %v2315_v25 = vpop.xlane.xlu0 %2314 }
 0x895   :  { %v2316_v0 = vmul.f32 %v2315_v25, %v2308_v24 }
 0x897   :  { %v2320_v28 = vmul.f32 0.25, %v2316_v0 }
 0x899   :  { %v2321_v29 = vmul.f32 %v2320_v28, %v2319_v27 }
 0x89b   :  { %v2322_v30 = vadd.f32 0.25, %v2321_v29 }
 0x89d   :  { %2954 = vmatmul.mubr.msk.f32.vlgmr.msra.gmra.mrb[24].mxu1 %vm2325_vm4, %v2322_v30 }
 0x970   :  { %v2398_v32 = vpop.f32.mrb[24].mxu1 }
 0x971   :  { %v2399_v33 = vadd.f32 %v2398_v32, %v2324_v31  ;;  %v2955_v34 = vpop.f32.mrb[25].mxu1 }
 0x973   :  { %2402 = vst.msk [vmem:[#allocation12] sm:$0x1] %vm2305_vm1, %v2399_v33 }
 0x974   :  { %3378 = shalt.err (!%p3375_p8)
}
 0x975   :  { %s4215_s11 = sld [smem:[#allocation21_spill]] }
 0x97b   :  { %s3379_s18 = scalar_lea.hbm %s4215_s11, 16 }
 0x97c   :  { %p3380_p9 = scmp.ne.s32.totalorder %s4215_s11, %s3379_s18  ;;  %p3383_p10 = scmp.lt.u32.totalorder %s3379_s18, %s4215_s11 }
 0x97e   :  { %p3385_p11 = pnand %p3383_p10, %p3380_p9 }
 0x980   :  { %3388 = shalt.err (!%p3385_p11)
}
 0x981   :  { %2412 = dma.vmem_to_hbm [thread:$0]  %s2410_s21, 16, %s4215_s11, [#allocation6]  }
 0x982   :  { %3395 = dma.done.wait [#allocation6], 16  }
 0x983   :  { %3396 = vsyncadd [#allocation6], 4294967280 }
 0x984   :  { %2416 = vsyncpa [#allocation5], 1 }
 0x985   :  { %2417 = vsyncpa [#allocation8], 1 }
 0x986   :  { %2418 = vsyncpa [#allocation11], 1 }
 0x987   :  { %2419 = vsyncpa [#allocation6], 1 }

</bundles_post_ra>
